<compile_context>
chip_gen: v6e
topology: v6e:2x2x1
jax: 0.10.0
libtpu: 0.0.40
codegen_flags: <defaults>
</compile_context>

<pallas_src>
import functools

import jax
import jax.numpy as jnp
from jax.experimental import pallas as pl
from jax.experimental.pallas import tpu as pltpu

# ---------------------------------------------------------------------------
# Hyper-parameters (small, synthetic)
# ---------------------------------------------------------------------------
MODEL_DIM = 32                      # model_dim
NUM_HEADS = 4                       # attn_params.num_attn_heads
DIM_KV    = MODEL_DIM // 2          # dim_key = dim_value = model_dim // 2
DIM_HEAD  = DIM_KV // NUM_HEADS
LT_G      = 4                       # long_term_attn_g (patch size)

# Rows per head in the packed projection weight: [Wq_h; Wk_h; Wv_h; zero pad].
# Padding each head block to a multiple of 8 rows keeps the in-kernel
# (H*HEAD_ROWS, NT) -> (H, HEAD_ROWS, NT) split aligned to f32 sublane tiles.
HEAD_ROWS = ((3 * DIM_HEAD + 7) // 8) * 8


def _erf_poly(x):
    # Abramowitz & Stegun 7.1.26 polynomial erf (|err| < 1.5e-7), built only
    # from ops with guaranteed Mosaic lowerings (exp, mul, add, where, abs).
    a1, a2, a3, a4, a5 = 0.254829592, -0.284496736, 1.421413741, -1.453152027, 1.061405429
    p = 0.3275911
    ax = jnp.abs(x)
    t = 1.0 / (1.0 + p * ax)
    poly = ((((a5 * t + a4) * t + a3) * t + a2) * t + a1) * t
    y = 1.0 - poly * jnp.exp(-ax * ax)
    return jnp.where(x >= 0, y, -y)


def _gelu_exact(x):
    # torch.nn.GELU() default is the exact erf formulation.
    # TODO(synk): uses a 1.5e-7-accurate erf polynomial since lax.erf has no
    #             guaranteed Mosaic lowering; numerically identical at f32.
    return 0.5 * x * (1.0 + _erf_poly(x * (1.0 / jnp.sqrt(jnp.float32(2.0)))))


# ---------------------------------------------------------------------------
# Pallas kernel: one block of SB long-term sequences (NT = SB*NP tokens) per
# grid step; attention is block-diagonal over sequences within the block.
# ---------------------------------------------------------------------------
def _ltc_attn_kernel(NP, SB, separate_v, mxu_dtype,
                     x_ref, keym_ref, w_ref, wo_ref, bo_ref,
                     out_ref, attn_ref):
    H, DH = NUM_HEADS, DIM_HEAD
    NT = SB * NP

    # ---- fused, bias-folded q/k/v projection (one bf16 MXU matmul) -------
    if separate_v:
        proj_qk = jnp.dot(w_ref[...], x_ref[0, 0], preferred_element_type=jnp.float32)
        proj_v = jnp.dot(w_ref[...], x_ref[0, 1], preferred_element_type=jnp.float32)
    else:
        proj_qk = jnp.dot(w_ref[...], x_ref[0], preferred_element_type=jnp.float32)
        proj_v = proj_qk
    # 8-row-aligned sublane split: per head rows are [q(DH), k(DH), v(DH), pad]
    p3q = proj_qk.reshape(H, HEAD_ROWS, NT)
    p3v = proj_v.reshape(H, HEAD_ROWS, NT)
    qh = p3q[:, 0:DH, :]                    # (H, DH, NT); 1/sqrt(DH) folded into Wq
    kh = p3q[:, DH:2 * DH, :]
    vh = p3v[:, 2 * DH:3 * DH, :]

    # ---- block-diagonal + key mask rebuilt in-kernel (no NT^2 mask DMA) ---
    rows = jax.lax.broadcasted_iota(jnp.int32, (NT, NT), 0).astype(jnp.float32)
    cols = jax.lax.broadcasted_iota(jnp.int32, (NT, NT), 1).astype(jnp.float32)
    inv_np = 1.0 / float(NP)                 # division-free exact floor-div trick
    same = jnp.floor((rows + 0.5) * inv_np) == jnp.floor((cols + 0.5) * inv_np)
    valid = jnp.logical_and(same, keym_ref[0] > 0.5)          # (NT, NT)

    # ---- all heads batched: one score matmul + one masked softmax chain ---
    sc = jax.lax.dot_general(qh, kh, (((1,), (1,)), ((0,), (0,))),
                             preferred_element_type=jnp.float32)   # (H, NT, NT)
    sc = jnp.where(valid[None, :, :], sc, -jnp.inf)                # masked_fill(-inf)
    m = jnp.max(sc, axis=-1, keepdims=True)
    p = jnp.exp(sc - m)
    p = p * pl.reciprocal(jnp.sum(p, axis=-1, keepdims=True), approx=True)

    # ---- emit only the per-sequence diagonal (NP, NP) attention blocks ----
    for s in range(SB):                      # static unroll over sequences
        attn_ref[0, s] = p[:, s * NP:(s + 1) * NP, s * NP:(s + 1) * NP]

    # ---- context -> GELU -> out_proj, all batched over heads (no scratch) -
    ctx = jax.lax.dot_general(vh, p, (((2,), (2,)), ((0,), (0,))),
                              preferred_element_type=jnp.float32)  # (H, DH, NT)
    act = _gelu_exact(ctx).astype(mxu_dtype)
    yh = jax.lax.dot_general(wo_ref[...], act, (((2,), (1,)), ((0,), (0,))),
                             preferred_element_type=jnp.float32)   # (H, D, NT)
    out_ref[0] = (jnp.sum(yh, axis=0) + bo_ref[...]).astype(out_ref.dtype)


# ---------------------------------------------------------------------------
# Wrapper: patch/token reshapes (glue), weight packing and pallas_call.
# ---------------------------------------------------------------------------
def _to_lt_patches(x, g, pad, num_patches):
    # convert_to_patches + rearrange 'b d num_patches patch_size -> (b ps) d num_patches'
    B, C, _ = x.shape
    x = jnp.pad(x, ((0, 0), (0, 0), (0, pad)))
    x = x.reshape(B, C, num_patches, g)
    return jnp.transpose(x, (0, 3, 1, 2)).reshape(B * g, C, num_patches)


def _to_token_major(x, g, pad, num_patches):
    # (B, C, T) -> (C, B*g*NP), token index t = (b*g + ps)*NP + np
    B, C, _ = x.shape
    x = jnp.pad(x, ((0, 0), (0, 0), (0, pad)))
    x = x.reshape(B, C, num_patches, g)
    return jnp.transpose(x, (1, 0, 3, 2)).reshape(C, B * g * num_patches)


def _tensorcores_per_chip():
    try:
        kind = jax.devices()[0].device_kind.lower()
    except Exception:
        return 1
    return 2 if ("v7" in kind or "7x" in kind) else 1


def _pack_qkv_weights(params, dtype):
    """Packed projection weight (H*HEAD_ROWS, D+1): per head [Wq; Wk; Wv; 0],
    with biases folded into the last column and 1/sqrt(DH) folded into Wq."""
    scale = 1.0 / float(DIM_HEAD) ** 0.5
    wq, wk, wv = params["wq"] * scale, params["wk"], params["wv"]
    bq, bk, bv = params["bq"] * scale, params["bk"], params["bv"]
    pad_rows = HEAD_ROWS - 3 * DIM_HEAD
    blocks = []
    for h in range(NUM_HEADS):
        sl = slice(h * DIM_HEAD, (h + 1) * DIM_HEAD)
        w_blk = jnp.concatenate(
            [wq[sl], wk[sl], wv[sl], jnp.zeros((pad_rows, MODEL_DIM), jnp.float32)], axis=0)
        b_blk = jnp.concatenate(
            [bq[sl], bk[sl], bv[sl], jnp.zeros((pad_rows, 1), jnp.float32)], axis=0)
        blocks.append(jnp.concatenate([w_blk, b_blk], axis=1))     # (HEAD_ROWS, D+1)
    return jnp.concatenate(blocks, axis=0).astype(dtype)           # (H*HEAD_ROWS, D+1)


def lt_context_attention(qk, params, v=None, masks=None, g=LT_G,
                         mxu_dtype=jnp.bfloat16):
    """qk: (B, MODEL_DIM, T) f32; v: optional same shape; masks: (B, 1, T) or None."""
    B, D, T = qk.shape
    pad = (-T) % g
    NP = (T + pad) // g
    BG = B * g
    N = BG * NP
    H = NUM_HEADS
    separate_v = v is not None

    # ---- token-major packing, with a ones row appended for the bias fold --
    def tokens_aug(x):
        xt = _to_token_major(x, g, pad, NP)                        # (D, N)
        return jnp.concatenate([xt, jnp.ones((1, N), jnp.float32)], axis=0)

    x_qk = tokens_aug(qk)
    if masks is None:
        m_tok = jnp.ones((1, N), jnp.float32)
    else:
        m_tok = _to_token_major(masks.astype(jnp.float32), g, pad, NP)  # (1, N)

    # Sequence-blocks per grid step: 1 on single-TC v5e/v6e (denser lanes,
    # fewer per-step overheads), num_TCs on dual-TC v7x ("parallel" axis).
    n_tc = _tensorcores_per_chip()
    nb = n_tc if (n_tc > 1 and BG % n_tc == 0) else 1
    SB = BG // nb
    NT = SB * NP
    # TODO(synk): at production sizes pick SB so NT per step >= 128 (lane-dense
    # stores) while the ~2x-buffered {x, out} plus the (H, NT, NT) score block
    # stay inside the per-generation VMEM budget (64 MiB on v7x).

    if separate_v:
        xs = jnp.stack([x_qk, tokens_aug(v)], axis=0)              # (2, D+1, N)
        xs = xs.reshape(2, D + 1, nb, NT).transpose(2, 0, 1, 3).astype(mxu_dtype)
        x_spec = pl.BlockSpec((1, 2, D + 1, NT), lambda i: (i, 0, 0, 0))
    else:
        xs = x_qk.reshape(D + 1, nb, NT).transpose(1, 0, 2).astype(mxu_dtype)
        x_spec = pl.BlockSpec((1, D + 1, NT), lambda i: (i, 0, 0))

    keym = m_tok.reshape(nb, 1, NT)                                # 1-D key mask only
    w_aug = _pack_qkv_weights(params, mxu_dtype)                   # (H*HEAD_ROWS, D+1)
    wo3 = params["wo"].reshape(D, H, DIM_HEAD).transpose(1, 0, 2).astype(mxu_dtype)
    bo = params["bo"]                                              # (D, 1) f32

    kern = functools.partial(_ltc_attn_kernel, NP, SB, separate_v, mxu_dtype)
    out_blk, attn_blk = pl.pallas_call(
        kern,
        out_shape=(jax.ShapeDtypeStruct((nb, D, NT), jnp.float32),
                   jax.ShapeDtypeStruct((nb, SB, H, NP, NP), jnp.float32)),
        grid=(nb,),
        in_specs=[
            x_spec,
            pl.BlockSpec((1, 1, NT), lambda i: (i, 0, 0)),
            pl.BlockSpec((H * HEAD_ROWS, D + 1), lambda i: (0, 0)),
            pl.BlockSpec((H, D, DIM_HEAD), lambda i: (0, 0, 0)),
            pl.BlockSpec((D, 1), lambda i: (0, 0)),
        ],
        out_specs=(pl.BlockSpec((1, D, NT), lambda i: (i, 0, 0)),
                   pl.BlockSpec((1, SB, H, NP, NP), lambda i: (i, 0, 0, 0, 0))),
        compiler_params=pltpu.CompilerParams(
            dimension_semantics=("parallel",),
            vmem_limit_bytes=32 * 1024 * 1024),
    )(xs, keym, w_aug, wo3, bo)

    # ---- undo token packing: (nb, D, NT) -> (B, D, T) ----
    y = out_blk.transpose(1, 0, 2).reshape(D, N)
    y = y.reshape(D, B, g, NP).transpose(1, 0, 3, 2).reshape(B, D, NP * g)[:, :, :T]
    if masks is not None:
        y = y * masks

    # diagonal attention blocks already in per-sequence order: (BG, H, NP, NP)
    attn = attn_blk.reshape(BG, H, NP, NP)
    return y, attn


# ---------------------------------------------------------------------------
# Pure-JAX reference (for correctness check only).
# ---------------------------------------------------------------------------
def reference_forward(qk, params, masks, g=LT_G):
    B, D, T = qk.shape
    pad = (-T) % g
    NP = (T + pad) // g
    BG = B * g
    q_lt = _to_lt_patches(qk, g, pad, NP)
    k_lt = q_lt
    v_lt = q_lt
    m_lt = (_to_lt_patches(masks.astype(jnp.float32), g, pad, NP)
            if masks is not None else jnp.ones((BG, 1, NP), jnp.float32))

    def proj(w, b, x):
        return jnp.einsum('od,bdn->bon', w, x) + b[None]

    q = proj(params['wq'], params['bq'], q_lt)
    k = proj(params['wk'], params['bk'], k_lt)
    v = proj(params['wv'], params['bv'], v_lt)
    qh = q.reshape(BG, NUM_HEADS, DIM_HEAD, NP)
    kh = k.reshape(BG, NUM_HEADS, DIM_HEAD, NP)
    vh = v.reshape(BG, NUM_HEADS, DIM_HEAD, NP)
    sc = jnp.einsum('bhdq,bhdk->bhqk', qh, kh) / jnp.sqrt(jnp.float32(DIM_HEAD))
    sc = jnp.where(m_lt[:, None, :, :] > 0.5, sc, -jnp.inf)
    p = jax.nn.softmax(sc, axis=-1)
    ctx = jnp.einsum('bhqk,bhdk->bhdq', p, vh).reshape(BG, DIM_KV, NP)
    act = 0.5 * ctx * (1.0 + jax.scipy.special.erf(ctx / jnp.sqrt(jnp.float32(2.0))))
    y = jnp.einsum('od,bdn->bon', params['wo'], act) + params['bo'][None]
    x = y.reshape(B, g, D, NP)
    x = jnp.transpose(x, (0, 2, 3, 1)).reshape(B, D, NP * g)[:, :, :T]
    if masks is not None:
        x = x * masks
    return x, p


def init_params(key):
    ks = jax.random.split(key, 8)
    return {
        "wq": 0.05 * jax.random.normal(ks[0], (DIM_KV, MODEL_DIM), jnp.float32),
        "bq": 0.01 * jax.random.normal(ks[1], (DIM_KV, 1), jnp.float32),
        "wk": 0.05 * jax.random.normal(ks[2], (DIM_KV, MODEL_DIM), jnp.float32),
        "bk": 0.01 * jax.random.normal(ks[3], (DIM_KV, 1), jnp.float32),
        "wv": 0.05 * jax.random.normal(ks[4], (DIM_KV, MODEL_DIM), jnp.float32),
        "bv": 0.01 * jax.random.normal(ks[5], (DIM_KV, 1), jnp.float32),
        "wo": 0.05 * jax.random.normal(ks[6], (MODEL_DIM, DIM_KV), jnp.float32),
        "bo": 0.01 * jax.random.normal(ks[7], (MODEL_DIM, 1), jnp.float32),
    }


if __name__ == "__main__":
    B, T = 2, 18                    # T not divisible by g -> exercises padding/masking
    key = jax.random.PRNGKey(0)
    kx, kp = jax.random.split(key)
    qk = jax.random.normal(kx, (B, MODEL_DIM, T), jnp.float32)
    masks = jnp.ones((B, 1, T), jnp.float32)
    params = init_params(kp)

    out, attn = lt_context_attention(qk, params, v=None, masks=masks)
    out = jax.block_until_ready(out)
    attn = jax.block_until_ready(attn)

    ref_out, ref_attn = reference_forward(qk, params, masks)
    assert out.shape == (B, MODEL_DIM, T), out.shape
    assert attn.shape == ref_attn.shape, (attn.shape, ref_attn.shape)
    assert jnp.allclose(out, ref_out, atol=2e-2, rtol=2e-2), "output mismatch"
    assert jnp.allclose(attn, ref_attn, atol=2e-2, rtol=2e-2), "attention mismatch"
    print("KERNEL_OK")
</pallas_src>

<mosaic_0001>
module attributes {stable_mosaic.version = 11 : i64} {
  func.func @_ltc_attn_kernel(%arg0: i32, %arg1: memref<1x33x40xbf16, #tpu.memory_space<vmem>>, %arg2: memref<1x1x40xf32, #tpu.memory_space<vmem>>, %arg3: memref<64x33xbf16, #tpu.memory_space<vmem>>, %arg4: memref<4x32x4xbf16, #tpu.memory_space<vmem>>, %arg5: memref<32x1xf32, #tpu.memory_space<vmem>>, %arg6: memref<1x32x40xf32, #tpu.memory_space<vmem>>, %arg7: memref<1x8x4x5x5xf32, #tpu.memory_space<vmem>>) attributes {dimension_semantics = [#tpu.dimension_semantics<parallel>], iteration_bounds = array<i64: 1>, scalar_prefetch = 0 : i64, scratch_operands = 0 : i64, tpu.core_type = #tpu.core_type<tc>, window_params = [{transform_indices = @transform_0, window_bounds = array<i64: 1, 33, 40>}, {transform_indices = @transform_1, window_bounds = array<i64: 1, 1, 40>}, {pipeline_mode = #tpu.pipeline_mode<synchronous>, transform_indices = @transform_2, window_bounds = array<i64: 64, 33>}, {pipeline_mode = #tpu.pipeline_mode<synchronous>, transform_indices = @transform_3, window_bounds = array<i64: 4, 32, 4>}, {pipeline_mode = #tpu.pipeline_mode<synchronous>, transform_indices = @transform_4, window_bounds = array<i64: 32, 1>}, {transform_indices = @transform_5, window_bounds = array<i64: 1, 32, 40>}, {transform_indices = @transform_6, window_bounds = array<i64: 1, 8, 4, 5, 5>}]} {
    %c0 = arith.constant 0 : index
    %c0_0 = arith.constant 0 : index
    %0 = vector.load %arg3[%c0, %c0_0] : memref<64x33xbf16, #tpu.memory_space<vmem>>, vector<64x33xbf16>
    %c0_1 = arith.constant 0 : index
    %c0_2 = arith.constant 0 : index
    %c0_3 = arith.constant 0 : index
    %1 = vector.load %arg1[%c0_1, %c0_2, %c0_3] : memref<1x33x40xbf16, #tpu.memory_space<vmem>>, vector<1x33x40xbf16>
    %2 = vector.shape_cast %1 : vector<1x33x40xbf16> to vector<33x40xbf16>
    %cst = arith.constant dense<0.000000e+00> : vector<64x40xf32>
    %3 = tpu.matmul %0, %2, %cst {dimension_numbers = #tpu.dot_dimension_numbers<[1], [0], [0], [1], [0, 0, 1, 1], [], []>} : vector<64x33xbf16>, vector<33x40xbf16>, vector<64x40xf32> -> vector<64x40xf32>
    %4 = vector.shape_cast %3 : vector<64x40xf32> to vector<4x16x40xf32>
    %5 = vector.shape_cast %3 : vector<64x40xf32> to vector<4x16x40xf32>
    %6 = vector.extract_strided_slice %4 {offsets = [0, 0, 0], sizes = [4, 4, 40], strides = [1, 1, 1]} : vector<4x16x40xf32> to vector<4x4x40xf32>
    %7 = vector.extract_strided_slice %4 {offsets = [0, 4, 0], sizes = [4, 4, 40], strides = [1, 1, 1]} : vector<4x16x40xf32> to vector<4x4x40xf32>
    %8 = vector.extract_strided_slice %5 {offsets = [0, 8, 0], sizes = [4, 4, 40], strides = [1, 1, 1]} : vector<4x16x40xf32> to vector<4x4x40xf32>
    %9 = tpu.iota {dimensions = array<i32: 0>} : vector<40x40xi32>
    %10 = arith.sitofp %9 : vector<40x40xi32> to vector<40x40xf32>
    %11 = tpu.iota {dimensions = array<i32: 1>} : vector<40x40xi32>
    %12 = arith.sitofp %11 : vector<40x40xi32> to vector<40x40xf32>
    %cst_4 = arith.constant 5.000000e-01 : f32
    %13 = vector.broadcast %cst_4 : f32 to vector<40x40xf32>
    %14 = arith.addf %10, %13 : vector<40x40xf32>
    %cst_5 = arith.constant 2.000000e-01 : f32
    %15 = vector.broadcast %cst_5 : f32 to vector<40x40xf32>
    %16 = arith.mulf %14, %15 : vector<40x40xf32>
    %17 = math.floor %16 : vector<40x40xf32>
    %cst_6 = arith.constant 5.000000e-01 : f32
    %18 = vector.broadcast %cst_6 : f32 to vector<40x40xf32>
    %19 = arith.addf %12, %18 : vector<40x40xf32>
    %cst_7 = arith.constant 2.000000e-01 : f32
    %20 = vector.broadcast %cst_7 : f32 to vector<40x40xf32>
    %21 = arith.mulf %19, %20 : vector<40x40xf32>
    %22 = math.floor %21 : vector<40x40xf32>
    %23 = arith.cmpf oeq, %17, %22 : vector<40x40xf32>
    %c0_8 = arith.constant 0 : index
    %c0_9 = arith.constant 0 : index
    %c0_10 = arith.constant 0 : index
    %24 = vector.load %arg2[%c0_8, %c0_9, %c0_10] : memref<1x1x40xf32, #tpu.memory_space<vmem>>, vector<1x1x40xf32>
    %25 = vector.shape_cast %24 : vector<1x1x40xf32> to vector<1x40xf32>
    %cst_11 = arith.constant 5.000000e-01 : f32
    %26 = vector.broadcast %cst_11 : f32 to vector<1x40xf32>
    %27 = arith.cmpf ogt, %25, %26 : vector<1x40xf32>
    %28 = vector.broadcast %27 : vector<1x40xi1> to vector<40x40xi1>
    %29 = arith.andi %23, %28 : vector<40x40xi1>
    %cst_12 = arith.constant dense<0.000000e+00> : vector<4x40x40xf32>
    %30 = tpu.matmul %6, %7, %cst_12 {dimension_numbers = #tpu.dot_dimension_numbers<[1], [1], [2], [2], [0, 0, 0, 2, 1, 2], [0], [0]>} : vector<4x4x40xf32>, vector<4x4x40xf32>, vector<4x40x40xf32> -> vector<4x40x40xf32>
    %31 = vector.shape_cast %29 : vector<40x40xi1> to vector<1x40x40xi1>
    %cst_13 = arith.constant 0xFF800000 : f32
    %32 = vector.shape_cast %31 : vector<1x40x40xi1> to vector<1x40x40xi1>
    %33 = vector.broadcast %32 : vector<1x40x40xi1> to vector<4x40x40xi1>
    %34 = vector.broadcast %cst_13 : f32 to vector<4x40x40xf32>
    %35 = arith.select %33, %30, %34 : vector<4x40x40xi1>, vector<4x40x40xf32>
    %cst_14 = arith.constant dense<0xFF800000> : vector<4x40xf32>
    %36 = vector.multi_reduction <maximumf>, %35, %cst_14 [2] : vector<4x40x40xf32> to vector<4x40xf32>
    %37 = vector.shape_cast %36 : vector<4x40xf32> to vector<4x40x1xf32>
    %38 = vector.broadcast %37 : vector<4x40x1xf32> to vector<4x40x40xf32>
    %39 = arith.subf %35, %38 : vector<4x40x40xf32>
    %40 = math.exp %39 : vector<4x40x40xf32>
    %cst_15 = arith.constant dense<0.000000e+00> : vector<4x40xf32>
    %41 = vector.multi_reduction <add>, %40, %cst_15 [2] : vector<4x40x40xf32> to vector<4x40xf32>
    %42 = vector.shape_cast %41 : vector<4x40xf32> to vector<4x40x1xf32>
    %43 = tpu.reciprocal %42 {approx = true} : vector<4x40x1xf32> -> vector<4x40x1xf32>
    %44 = vector.broadcast %43 : vector<4x40x1xf32> to vector<4x40x40xf32>
    %45 = arith.mulf %40, %44 : vector<4x40x40xf32>
    %46 = vector.extract_strided_slice %45 {offsets = [0, 0, 0], sizes = [4, 5, 5], strides = [1, 1, 1]} : vector<4x40x40xf32> to vector<4x5x5xf32>
    %c0_16 = arith.constant 0 : index
    %c0_17 = arith.constant 0 : index
    %c0_18 = arith.constant 0 : index
    %c0_19 = arith.constant 0 : index
    %c0_20 = arith.constant 0 : index
    %47 = vector.load %arg7[%c0_16, %c0_17, %c0_18, %c0_19, %c0_20] : memref<1x8x4x5x5xf32, #tpu.memory_space<vmem>>, vector<1x1x4x5x5xf32>
    %48 = vector.shape_cast %47 : vector<1x1x4x5x5xf32> to vector<4x5x5xf32>
    %49 = vector.shape_cast %46 : vector<4x5x5xf32> to vector<1x1x4x5x5xf32>
    tpu.vector_store %arg7[%c0_16, %c0_17, %c0_18, %c0_19, %c0_20], %49 {strides = array<i32>} : memref<1x8x4x5x5xf32, #tpu.memory_space<vmem>>, vector<1x1x4x5x5xf32>,
    %50 = vector.extract_strided_slice %45 {offsets = [0, 5, 5], sizes = [4, 5, 5], strides = [1, 1, 1]} : vector<4x40x40xf32> to vector<4x5x5xf32>
    %c0_21 = arith.constant 0 : index
    %c1 = arith.constant 1 : index
    %c0_22 = arith.constant 0 : index
    %c0_23 = arith.constant 0 : index
    %c0_24 = arith.constant 0 : index
    %51 = vector.load %arg7[%c0_21, %c1, %c0_22, %c0_23, %c0_24] : memref<1x8x4x5x5xf32, #tpu.memory_space<vmem>>, vector<1x1x4x5x5xf32>
    %52 = vector.shape_cast %51 : vector<1x1x4x5x5xf32> to vector<4x5x5xf32>
    %53 = vector.shape_cast %50 : vector<4x5x5xf32> to vector<1x1x4x5x5xf32>
    tpu.vector_store %arg7[%c0_21, %c1, %c0_22, %c0_23, %c0_24], %53 {strides = array<i32>} : memref<1x8x4x5x5xf32, #tpu.memory_space<vmem>>, vector<1x1x4x5x5xf32>,
    %54 = vector.extract_strided_slice %45 {offsets = [0, 10, 10], sizes = [4, 5, 5], strides = [1, 1, 1]} : vector<4x40x40xf32> to vector<4x5x5xf32>
    %c0_25 = arith.constant 0 : index
    %c2 = arith.constant 2 : index
    %c0_26 = arith.constant 0 : index
    %c0_27 = arith.constant 0 : index
    %c0_28 = arith.constant 0 : index
    %55 = vector.load %arg7[%c0_25, %c2, %c0_26, %c0_27, %c0_28] : memref<1x8x4x5x5xf32, #tpu.memory_space<vmem>>, vector<1x1x4x5x5xf32>
    %56 = vector.shape_cast %55 : vector<1x1x4x5x5xf32> to vector<4x5x5xf32>
    %57 = vector.shape_cast %54 : vector<4x5x5xf32> to vector<1x1x4x5x5xf32>
    tpu.vector_store %arg7[%c0_25, %c2, %c0_26, %c0_27, %c0_28], %57 {strides = array<i32>} : memref<1x8x4x5x5xf32, #tpu.memory_space<vmem>>, vector<1x1x4x5x5xf32>,
    %58 = vector.extract_strided_slice %45 {offsets = [0, 15, 15], sizes = [4, 5, 5], strides = [1, 1, 1]} : vector<4x40x40xf32> to vector<4x5x5xf32>
    %c0_29 = arith.constant 0 : index
    %c3 = arith.constant 3 : index
    %c0_30 = arith.constant 0 : index
    %c0_31 = arith.constant 0 : index
    %c0_32 = arith.constant 0 : index
    %59 = vector.load %arg7[%c0_29, %c3, %c0_30, %c0_31, %c0_32] : memref<1x8x4x5x5xf32, #tpu.memory_space<vmem>>, vector<1x1x4x5x5xf32>
    %60 = vector.shape_cast %59 : vector<1x1x4x5x5xf32> to vector<4x5x5xf32>
    %61 = vector.shape_cast %58 : vector<4x5x5xf32> to vector<1x1x4x5x5xf32>
    tpu.vector_store %arg7[%c0_29, %c3, %c0_30, %c0_31, %c0_32], %61 {strides = array<i32>} : memref<1x8x4x5x5xf32, #tpu.memory_space<vmem>>, vector<1x1x4x5x5xf32>,
    %62 = vector.extract_strided_slice %45 {offsets = [0, 20, 20], sizes = [4, 5, 5], strides = [1, 1, 1]} : vector<4x40x40xf32> to vector<4x5x5xf32>
    %c0_33 = arith.constant 0 : index
    %c4 = arith.constant 4 : index
    %c0_34 = arith.constant 0 : index
    %c0_35 = arith.constant 0 : index
    %c0_36 = arith.constant 0 : index
    %63 = vector.load %arg7[%c0_33, %c4, %c0_34, %c0_35, %c0_36] : memref<1x8x4x5x5xf32, #tpu.memory_space<vmem>>, vector<1x1x4x5x5xf32>
    %64 = vector.shape_cast %63 : vector<1x1x4x5x5xf32> to vector<4x5x5xf32>
    %65 = vector.shape_cast %62 : vector<4x5x5xf32> to vector<1x1x4x5x5xf32>
    tpu.vector_store %arg7[%c0_33, %c4, %c0_34, %c0_35, %c0_36], %65 {strides = array<i32>} : memref<1x8x4x5x5xf32, #tpu.memory_space<vmem>>, vector<1x1x4x5x5xf32>,
    %66 = vector.extract_strided_slice %45 {offsets = [0, 25, 25], sizes = [4, 5, 5], strides = [1, 1, 1]} : vector<4x40x40xf32> to vector<4x5x5xf32>
    %c0_37 = arith.constant 0 : index
    %c5 = arith.constant 5 : index
    %c0_38 = arith.constant 0 : index
    %c0_39 = arith.constant 0 : index
    %c0_40 = arith.constant 0 : index
    %67 = vector.load %arg7[%c0_37, %c5, %c0_38, %c0_39, %c0_40] : memref<1x8x4x5x5xf32, #tpu.memory_space<vmem>>, vector<1x1x4x5x5xf32>
    %68 = vector.shape_cast %67 : vector<1x1x4x5x5xf32> to vector<4x5x5xf32>
    %69 = vector.shape_cast %66 : vector<4x5x5xf32> to vector<1x1x4x5x5xf32>
    tpu.vector_store %arg7[%c0_37, %c5, %c0_38, %c0_39, %c0_40], %69 {strides = array<i32>} : memref<1x8x4x5x5xf32, #tpu.memory_space<vmem>>, vector<1x1x4x5x5xf32>,
    %70 = vector.extract_strided_slice %45 {offsets = [0, 30, 30], sizes = [4, 5, 5], strides = [1, 1, 1]} : vector<4x40x40xf32> to vector<4x5x5xf32>
    %c0_41 = arith.constant 0 : index
    %c6 = arith.constant 6 : index
    %c0_42 = arith.constant 0 : index
    %c0_43 = arith.constant 0 : index
    %c0_44 = arith.constant 0 : index
    %71 = vector.load %arg7[%c0_41, %c6, %c0_42, %c0_43, %c0_44] : memref<1x8x4x5x5xf32, #tpu.memory_space<vmem>>, vector<1x1x4x5x5xf32>
    %72 = vector.shape_cast %71 : vector<1x1x4x5x5xf32> to vector<4x5x5xf32>
    %73 = vector.shape_cast %70 : vector<4x5x5xf32> to vector<1x1x4x5x5xf32>
    tpu.vector_store %arg7[%c0_41, %c6, %c0_42, %c0_43, %c0_44], %73 {strides = array<i32>} : memref<1x8x4x5x5xf32, #tpu.memory_space<vmem>>, vector<1x1x4x5x5xf32>,
    %74 = vector.extract_strided_slice %45 {offsets = [0, 35, 35], sizes = [4, 5, 5], strides = [1, 1, 1]} : vector<4x40x40xf32> to vector<4x5x5xf32>
    %c0_45 = arith.constant 0 : index
    %c7 = arith.constant 7 : index
    %c0_46 = arith.constant 0 : index
    %c0_47 = arith.constant 0 : index
    %c0_48 = arith.constant 0 : index
    %75 = vector.load %arg7[%c0_45, %c7, %c0_46, %c0_47, %c0_48] : memref<1x8x4x5x5xf32, #tpu.memory_space<vmem>>, vector<1x1x4x5x5xf32>
    %76 = vector.shape_cast %75 : vector<1x1x4x5x5xf32> to vector<4x5x5xf32>
    %77 = vector.shape_cast %74 : vector<4x5x5xf32> to vector<1x1x4x5x5xf32>
    tpu.vector_store %arg7[%c0_45, %c7, %c0_46, %c0_47, %c0_48], %77 {strides = array<i32>} : memref<1x8x4x5x5xf32, #tpu.memory_space<vmem>>, vector<1x1x4x5x5xf32>,
    %cst_49 = arith.constant dense<0.000000e+00> : vector<4x4x40xf32>
    %78 = tpu.matmul %8, %45, %cst_49 {dimension_numbers = #tpu.dot_dimension_numbers<[2], [2], [1], [1], [0, 0, 0, 1, 1, 1], [0], [0]>} : vector<4x4x40xf32>, vector<4x40x40xf32>, vector<4x4x40xf32> -> vector<4x4x40xf32>
    %cst_50 = arith.constant 5.000000e-01 : f32
    %79 = vector.broadcast %cst_50 : f32 to vector<4x4x40xf32>
    %80 = arith.mulf %79, %78 : vector<4x4x40xf32>
    %cst_51 = arith.constant 2.000000e+00 : f32
    %81 = math.sqrt %cst_51 : f32
    %cst_52 = arith.constant 1.000000e+00 : f32
    %82 = arith.divf %cst_52, %81 : f32
    %83 = vector.broadcast %82 : f32 to vector<4x4x40xf32>
    %84 = arith.mulf %78, %83 : vector<4x4x40xf32>
    %85 = math.absf %84 : vector<4x4x40xf32>
    %cst_53 = arith.constant 0.327591091 : f32
    %86 = vector.broadcast %cst_53 : f32 to vector<4x4x40xf32>
    %87 = arith.mulf %86, %85 : vector<4x4x40xf32>
    %cst_54 = arith.constant 1.000000e+00 : f32
    %88 = vector.broadcast %cst_54 : f32 to vector<4x4x40xf32>
    %89 = arith.addf %88, %87 : vector<4x4x40xf32>
    %cst_55 = arith.constant 1.000000e+00 : f32
    %90 = vector.broadcast %cst_55 : f32 to vector<4x4x40xf32>
    %91 = arith.divf %90, %89 : vector<4x4x40xf32>
    %cst_56 = arith.constant 1.06140542 : f32
    %92 = vector.broadcast %cst_56 : f32 to vector<4x4x40xf32>
    %93 = arith.mulf %92, %91 : vector<4x4x40xf32>
    %cst_57 = arith.constant -1.45315206 : f32
    %94 = vector.broadcast %cst_57 : f32 to vector<4x4x40xf32>
    %95 = arith.addf %93, %94 : vector<4x4x40xf32>
    %96 = arith.mulf %95, %91 : vector<4x4x40xf32>
    %cst_58 = arith.constant 1.42141378 : f32
    %97 = vector.broadcast %cst_58 : f32 to vector<4x4x40xf32>
    %98 = arith.addf %96, %97 : vector<4x4x40xf32>
    %99 = arith.mulf %98, %91 : vector<4x4x40xf32>
    %cst_59 = arith.constant -0.284496725 : f32
    %100 = vector.broadcast %cst_59 : f32 to vector<4x4x40xf32>
    %101 = arith.addf %99, %100 : vector<4x4x40xf32>
    %102 = arith.mulf %101, %91 : vector<4x4x40xf32>
    %cst_60 = arith.constant 0.254829586 : f32
    %103 = vector.broadcast %cst_60 : f32 to vector<4x4x40xf32>
    %104 = arith.addf %102, %103 : vector<4x4x40xf32>
    %105 = arith.mulf %104, %91 : vector<4x4x40xf32>
    %cst_61 = arith.constant 0.000000e+00 : f32
    %106 = vector.broadcast %cst_61 : f32 to vector<4x4x40xf32>
    %107 = arith.subf %106, %85 : vector<4x4x40xf32>
    %108 = arith.mulf %107, %85 : vector<4x4x40xf32>
    %109 = math.exp %108 : vector<4x4x40xf32>
    %110 = arith.mulf %105, %109 : vector<4x4x40xf32>
    %cst_62 = arith.constant 1.000000e+00 : f32
    %111 = vector.broadcast %cst_62 : f32 to vector<4x4x40xf32>
    %112 = arith.subf %111, %110 : vector<4x4x40xf32>
    %cst_63 = arith.constant 0.000000e+00 : f32
    %113 = vector.broadcast %cst_63 : f32 to vector<4x4x40xf32>
    %114 = arith.cmpf oge, %84, %113 : vector<4x4x40xf32>
    %cst_64 = arith.constant 0.000000e+00 : f32
    %115 = vector.broadcast %cst_64 : f32 to vector<4x4x40xf32>
    %116 = arith.subf %115, %112 : vector<4x4x40xf32>
    %117 = arith.select %114, %112, %116 : vector<4x4x40xi1>, vector<4x4x40xf32>
    %cst_65 = arith.constant 1.000000e+00 : f32
    %118 = vector.broadcast %cst_65 : f32 to vector<4x4x40xf32>
    %119 = arith.addf %118, %117 : vector<4x4x40xf32>
    %120 = arith.mulf %80, %119 : vector<4x4x40xf32>
    %121 = arith.truncf %120 : vector<4x4x40xf32> to vector<4x4x40xbf16>
    %c0_66 = arith.constant 0 : index
    %c0_67 = arith.constant 0 : index
    %c0_68 = arith.constant 0 : index
    %122 = vector.load %arg4[%c0_66, %c0_67, %c0_68] : memref<4x32x4xbf16, #tpu.memory_space<vmem>>, vector<4x32x4xbf16>
    %cst_69 = arith.constant dense<0.000000e+00> : vector<4x32x40xf32>
    %123 = tpu.matmul %122, %121, %cst_69 {dimension_numbers = #tpu.dot_dimension_numbers<[2], [1], [1], [2], [0, 0, 0, 1, 1, 2], [0], [0]>} : vector<4x32x4xbf16>, vector<4x4x40xbf16>, vector<4x32x40xf32> -> vector<4x32x40xf32>
    %cst_70 = arith.constant dense<0.000000e+00> : vector<32x40xf32>
    %124 = vector.multi_reduction <add>, %123, %cst_70 [0] : vector<4x32x40xf32> to vector<32x40xf32>
    %c0_71 = arith.constant 0 : index
    %c0_72 = arith.constant 0 : index
    %125 = vector.load %arg5[%c0_71, %c0_72] : memref<32x1xf32, #tpu.memory_space<vmem>>, vector<32x1xf32>
    %126 = vector.broadcast %125 : vector<32x1xf32> to vector<32x40xf32>
    %127 = arith.addf %124, %126 : vector<32x40xf32>
    %c0_73 = arith.constant 0 : index
    %c0_74 = arith.constant 0 : index
    %c0_75 = arith.constant 0 : index
    %128 = vector.load %arg6[%c0_73, %c0_74, %c0_75] : memref<1x32x40xf32, #tpu.memory_space<vmem>>, vector<1x32x40xf32>
    %129 = vector.shape_cast %128 : vector<1x32x40xf32> to vector<32x40xf32>
    %130 = vector.shape_cast %127 : vector<32x40xf32> to vector<1x32x40xf32>
    tpu.vector_store %arg6[%c0_73, %c0_74, %c0_75], %130 {strides = array<i32>} : memref<1x32x40xf32, #tpu.memory_space<vmem>>, vector<1x32x40xf32>,
    return
  }
  func.func @transform_0(%arg0: i32) -> (i32, i32, i32) {
    %c0_i32 = arith.constant 0 : i32
    %c0_i32_0 = arith.constant 0 : i32
    %c0_i32_1 = arith.constant 0 : i32
    return %arg0, %c0_i32, %c0_i32_0 : i32, i32, i32
  }
  func.func @transform_1(%arg0: i32) -> (i32, i32, i32) {
    %c0_i32 = arith.constant 0 : i32
    %c0_i32_0 = arith.constant 0 : i32
    %c0_i32_1 = arith.constant 0 : i32
    return %arg0, %c0_i32, %c0_i32_0 : i32, i32, i32
  }
  func.func @transform_2(%arg0: i32) -> (i32, i32) {
    %c0_i32 = arith.constant 0 : i32
    %c0_i32_0 = arith.constant 0 : i32
    %c0_i32_1 = arith.constant 0 : i32
    return %c0_i32, %c0_i32_0 : i32, i32
  }
  func.func @transform_3(%arg0: i32) -> (i32, i32, i32) {
    %c0_i32 = arith.constant 0 : i32
    %c0_i32_0 = arith.constant 0 : i32
    %c0_i32_1 = arith.constant 0 : i32
    %c0_i32_2 = arith.constant 0 : i32
    return %c0_i32, %c0_i32_0, %c0_i32_1 : i32, i32, i32
  }
  func.func @transform_4(%arg0: i32) -> (i32, i32) {
    %c0_i32 = arith.constant 0 : i32
    %c0_i32_0 = arith.constant 0 : i32
    %c0_i32_1 = arith.constant 0 : i32
    return %c0_i32, %c0_i32_0 : i32, i32
  }
  func.func @transform_5(%arg0: i32) -> (i32, i32, i32) {
    %c0_i32 = arith.constant 0 : i32
    %c0_i32_0 = arith.constant 0 : i32
    %c0_i32_1 = arith.constant 0 : i32
    return %arg0, %c0_i32, %c0_i32_0 : i32, i32, i32
  }
  func.func @transform_6(%arg0: i32) -> (i32, i32, i32, i32, i32) {
    %c0_i32 = arith.constant 0 : i32
    %c0_i32_0 = arith.constant 0 : i32
    %c0_i32_1 = arith.constant 0 : i32
    %c0_i32_2 = arith.constant 0 : i32
    %c0_i32_3 = arith.constant 0 : i32
    return %arg0, %c0_i32, %c0_i32_0, %c0_i32_1, %c0_i32_2 : i32, i32, i32, i32, i32
  }
}

</mosaic_0001>

<bundles_post_ra>
// kernel: tpu_custom_call.1
= control target key start
LH: loop header
LB: loop body
LE: loop exit
PB: predicated region body
PF: predicated region fallthrough
CT: control target
= control target key end

     0   :  { %vm85_vm0 = vcmask 1040384   ;;  %v2551_v1 = vmov 0   ;;  %vm72_vm1 = vcmask 269312   ;;  %s3429_s0 = inlined_call_operand.vmem [shape: bf16[1,33,40], index: 0, kind: input, shape index: {}]   ;;  %s3430_s1 = inlined_call_operand.vmem [shape: f32[1,1,40], index: 1, kind: input, shape index: {}]   ;;  %s3431_s2 = inlined_call_operand.vmem [shape: bf16[64,33], index: 2, kind: input, shape index: {}]   ;;  %s3432_s3 = inlined_call_operand.vmem [shape: bf16[4,32,4], index: 3, kind: input, shape index: {}]   ;;  %s3433_s4 = inlined_call_operand.vmem [shape: f32[32,1], index: 4, kind: input, shape index: {}]   ;;  %s3434_s5 = inlined_call_operand.hbm [shape: f32[1,32,40], index: 5, kind: output, shape index: {0}]   ;;  %s3435_s6 = inlined_call_operand.vmem [shape: f32[1,8,4,5,5], index: 6, kind: output, shape index: {1}]  }
   0x1   :  { %v2418_v0 = vld [vmem:[%s3429_s0 + $0x10] ss:$0 sps:$4 sm:$0x11]   ;;  %v87_v2 = vsel %vm85_vm0, 65535, %v2551_v1  ;;  %v2419_v4 = vld [vmem:[%s3429_s0 + $0x8] sm:$0xff]   ;;  %v2421_v5 = vld [vmem:[%s3431_s2] sm:$0xff]  }
   0x2   :  { %v89_v3 = vand.u32 %v2418_v0, %v87_v2  ;;  %2247 = vmatprep.mubr.msk.bf16.mxu0 %vm72_vm1, %v2421_v5  ;;  %v2420_v6 = vld [vmem:[%s3429_s0] sm:$0xff]   ;;  %v2422_v7 = vld [vmem:[%s3431_s2 + $0x8] sm:$0xff]  }
   0x4   :  { %2241 = vmatprep.subr.bf16.mxu0 %v89_v3 }
   0x5   :  { %2242 = vmatpush3.bf16.msra.mxu0 %v89_v3 }
   0x6   :  { %2243 = vmatprep.subr.bf16.mxu0 %v2419_v4 }
   0x9   :  { %2244 = vmatpush3.bf16.msra.mxu0 %v2419_v4 }
   0xa   :  { %2245 = vmatprep.subr.bf16.mxu0 %v2420_v6 }
   0xb   :  { %12 = vsyncpa [#allocation3], 0  ;;  %v2423_v8 = vld [vmem:[%s3431_s2 + $0x10] sm:$0xff]   ;;  %v2424_v9 = vld [vmem:[%s3431_s2 + $0x18] sm:$0xff]   ;;  %v2552_v10 = vmov 0.0   ;;  %vm2553_vm2 = vmmov 0   ;;  %v156_v41 = vlaneseq }
   0xc   :  { %2255 = vmatprep.subr.mxu1 %v2552_v10  ;;  %2257 = vmatprep.mubr.msk.f32.mxu1 %vm2553_vm2, %v2552_v10  ;;  %vm256_vm3 = vcmask 1043456   ;;  %vm240_vm4 = vcmask 31744   ;;  %v193_v51 = vld [vmem:[%s3430_s1] sm:$0x1]  ;;  %vm802_vm11 = vcmask 326656   ;;  %s2555_s18 = smov 118  }
   0xd   :  { %2246 = vmatpush3.bf16.msra.mxu0 %v2420_v6  ;;  %v157_v42 = vshrl.u32 %v156_v41, 7  ;;  %v168_v44 = vand.u32 127, %v156_v41  ;;  %vm194_vm5 = vcmp.gt.f32.partialorder %v193_v51, 0.5  ;;  %s2556_s21 = smov 113   ;;  %s2557_s22 = smov 108  }
   0xe   :  { %2289 = vmatprep.subr.mxu0 %v2552_v10  ;;  %v195_v62 = vsel %vm194_vm5, 1, %v2551_v1  ;;  %s2558_s25 = smov 103   ;;  %s2559_s28 = smov 98   ;;  %vm1084_vm5 = vcmask 38914  }
   0xf   :  { %v160_v43 = vadd.s32 24, %v157_v42  ;;  %v161_v46 = vadd.s32 32, %v157_v42  ;;  %v169_v47 = vcvt.s32.f32 %v168_v44  ;;  %v159_v48 = vadd.s32 16, %v157_v42  ;;  %s2560_s29 = smov 93  }
  0x10   :  { %2248 = vmatmul.mubr.msk.bf16.vlgmr.msra.gmra.mxu0 %vm72_vm1, %v2422_v7  ;;  %v158_v53 = vadd.s32 8, %v157_v42  ;;  %v198_v59 = vsub.s32 0, %v157_v42  ;;  %v162_v4 = vcvt.s32.f32 %v157_v42 }
  0x11   :  { %2251 = vmatprep.mubr.msk.bf16.mxu0 %vm72_vm1, %v2423_v8  ;;  %v165_v45 = vcvt.s32.f32 %v160_v43  ;;  %v166_v50 = vcvt.s32.f32 %v161_v46  ;;  %v185_v52 = vadd.f32 0.5, %v169_v47  ;;  %v164_v54 = vcvt.s32.f32 %v159_v48 }
  0x12   :  { %v163_v60 = vcvt.s32.f32 %v158_v53  ;;  %v199_v7 = vrot.slane %v195_v62, %v198_v59 }
  0x13   :  { %v173_v49 = vadd.f32 0.5, %v165_v45  ;;  %v174_v56 = vadd.f32 0.5, %v166_v50  ;;  %v186_v58 = vmul.f32 0.2, %v185_v52  ;;  %v172_v61 = vadd.f32 0.5, %v164_v54 }
  0x14   :  { %v171_v8 = vadd.f32 0.5, %v163_v60  ;;  %vm200_vm7 = vcmp.eq.s32.totalorder %v199_v7, 1 }
  0x15   :  { %v178_v55 = vmul.f32 0.2, %v173_v49  ;;  %v179_v3 = vmul.f32 0.2, %v174_v56  ;;  %v187_v6 = vfloor.f32 %v186_v58 }
  0x17   :  { %v183_v2 = vfloor.f32 %v178_v55 }
  0x18   :  { %2252 = vmatmul.mubr.msk.bf16.gmra.mxu0 %vm72_vm1, %v2424_v9  ;;  %v177_v9 = vmul.f32 0.2, %v172_v61 }
  0x19   :  { %2291 = vmatprep.mubr.msk.f32.mxu0 %vm2553_vm2, %v2552_v10  ;;  %vm191_vm6 = vcmp.eq.f32.partialorder %v183_v2, %v187_v6 }
  0x1a   :  { %vm2714_vm8 = vmand %vm191_vm6, %vm200_vm7  ;;  %vm1061_vm6 = vcmask 39941  }
  0xd0   :  { %v2249_v11 = vpop.f32.mrf.mxu0 }
  0xd1   :  { %v382_v19 = vrot.slane %v2249_v11, 4 }
  0xd2   :  { %v125_v12 = vpop.f32.mrf.mxu0 }
  0xd3   :  { %v239_v13 = vrot.slane %v125_v12, 4  ;;  %206 = vxpose.xlu0.b32.start.end [1/1] (short) (narrow) %v125_v12, 40 }
  0xd4   :  { %v2627_v14 = vpop.f32.mrf.mxu0 }
  0xd5   :  { %2256 = vmatpush3.msk.msra.mxu1 %vm256_vm3, %v239_v13  ;;  %v184_v13 = vfloor.f32 %v179_v3 }
  0xd6   :  { %v2630_v15 = vpop.f32.mrf.mxu0  ;;  %2272 = vmatprep.subr.mxu1 %v2552_v10 }
  0xd7   :  { %vm192_vm9 = vcmp.eq.f32.partialorder %v184_v13, %v187_v6 }
  0xd8   :  { %v2253_v16 = vpop.f32.mrf.mxu0  ;;  %vm2725_vm12 = vmand %vm192_vm9, %vm200_vm7  ;;  %vm1157_vm9 = vcmask 39940  }
  0xd9   :  { %v664_v28 = vrot.slane %v2253_v16, 4 }
  0xda   :  { %v141_v17 = vpop.f32.mrf.mxu0 }
  0xdb   :  { %v523_v18 = vrot.slane %v141_v17, 4  ;;  %490 = vxpose.xlu1.b32.start.end [1/1] (short) (narrow) %v141_v17, 40 }
  0xdc   :  { %v2707_v63 = vpop.f32.mrf.mxu0 }
  0xdd   :  { %2290 = vmatpush3.msk.msra.mxu0 %vm256_vm3, %v523_v18 }
  0xde   :  { %2323 = vmatprep.subr.mxu0 %v2552_v10 }
  0xe4   :  { %349 = vxpose.xlu0.b32.start.end [1/1] (short) (narrow) %v2249_v11, 40  ;;  %v2709_v11 = vpop.f32.mrf.mxu0 }
  0xec   :  { %631 = vxpose.xlu1.b32.start.end [1/1] (short) (narrow) %v2253_v16, 40  ;;  %v170_v16 = vadd.f32 0.5, %v162_v4 }
 0x10a   :  { %2417 = vset.pattern.permute.xlu1 %v2551_v1 }
 0x10d   :  { %2416 = vset.pattern.permute.xlu0 %v2551_v1  ;;  %v176_v1 = vmul.f32 0.2, %v171_v8 }
 0x14f   :  { %v222_v20 = vpop.trf.xlu0 }
 0x150   :  { %2258 = vmatmul.mubr.msk.f32.vlgmr.msra.gmra.mxu1 %vm240_vm4, %v222_v20 }
 0x151   :  { %2273 = vmatpush3.msk.msra.mxu1 %vm256_vm3, %v382_v19  ;;  %2260 = vmatprep.mubr.msk.f32.mxu1 %vm2553_vm2, %v2552_v10  ;;  %v182_v19 = vfloor.f32 %v177_v9 }
 0x152   :  { %2306 = vmatprep.subr.mxu1 %v2552_v10 }
 0x153   :  { %v223_v21 = vpop.trf.xlu0  ;;  %vm190_vm10 = vcmp.eq.f32.partialorder %v182_v19, %v187_v6 }
 0x154   :  { %2261 = vmatmul.mubr.msk.f32.gmra.mxu1 %vm240_vm4, %v223_v21  ;;  %vm2730_vm13 = vmand %vm190_vm10, %vm200_vm7  ;;  %vm1180_vm10 = vcmask 37889  }
 0x155   :  { %2263 = vmatprep.mubr.msk.f32.mxu1 %vm2553_vm2, %v2552_v10 }
 0x157   :  { %v224_v22 = vpop.trf.xlu0  ;;  %v506_v23 = vpop.trf.xlu1 }
 0x158   :  { %2264 = vmatmul.mubr.msk.f32.gmra.mxu1 %vm240_vm4, %v224_v22  ;;  %2292 = vmatmul.mubr.msk.f32.vlgmr.msra.gmra.mxu0 %vm240_vm4, %v506_v23  ;;  %v175_v23 = vmul.f32 0.2, %v170_v16 }
 0x159   :  { %2266 = vmatprep.mubr.msk.f32.mxu1 %vm2553_vm2, %v2552_v10  ;;  %2294 = vmatprep.mubr.msk.f32.mxu0 %vm2553_vm2, %v2552_v10 }
 0x15b   :  { %v225_v24 = vpop.trf.xlu0  ;;  %v507_v25 = vpop.trf.xlu1 }
 0x15c   :  { %2267 = vmatmul.mubr.msk.f32.gmra.mxu1 %vm240_vm4, %v225_v24  ;;  %2295 = vmatmul.mubr.msk.f32.gmra.mxu0 %vm240_vm4, %v507_v25 }
 0x15d   :  { %2269 = vmatprep.mubr.msk.f32.mxu1 %vm2553_vm2, %v2552_v10  ;;  %2297 = vmatprep.mubr.msk.f32.mxu0 %vm2553_vm2, %v2552_v10 }
 0x15f   :  { %v226_v26 = vpop.trf.xlu0  ;;  %v508_v27 = vpop.trf.xlu1 }
 0x160   :  { %2270 = vmatmul.mubr.msk.f32.gmra.mxu1 %vm240_vm4, %v226_v26  ;;  %2298 = vmatmul.mubr.msk.f32.gmra.mxu0 %vm240_vm4, %v508_v27  ;;  %v181_v26 = vfloor.f32 %v176_v1 }
 0x161   :  { %2274 = vmatprep.mubr.msk.f32.mxu1 %vm2553_vm2, %v2552_v10  ;;  %2300 = vmatprep.mubr.msk.f32.mxu0 %vm2553_vm2, %v2552_v10 }
 0x162   :  { %vm189_vm14 = vcmp.eq.f32.partialorder %v181_v26, %v187_v6 }
 0x163   :  { %v365_v29 = vpop.trf.xlu0  ;;  %v509_v30 = vpop.trf.xlu1  ;;  %vm2745_vm15 = vmand %vm189_vm14, %vm200_vm7  ;;  %vm1237_vm14 = vcmask 39939  }
 0x164   :  { %2275 = vmatmul.mubr.msk.f32.vlgmr.msra.gmra.mxu1 %vm240_vm4, %v365_v29  ;;  %2301 = vmatmul.mubr.msk.f32.gmra.mxu0 %vm240_vm4, %v509_v30 }
 0x165   :  { %2307 = vmatpush3.msk.msra.mxu1 %vm256_vm3, %v664_v28  ;;  %2277 = vmatprep.mubr.msk.f32.mxu1 %vm2553_vm2, %v2552_v10  ;;  %vm1023_vm3 = vcmask 36864  }
 0x166   :  { %2303 = vmatprep.mubr.msk.f32.mxu0 %vm2553_vm2, %v2552_v10  ;;  %2336 = vmatprep.subr.mxu1 %v2552_v10 }
 0x167   :  { %v366_v31 = vpop.trf.xlu0  ;;  %v510_v32 = vpop.trf.xlu1 }
 0x168   :  { %2278 = vmatmul.mubr.msk.f32.gmra.mxu1 %vm240_vm4, %v366_v31  ;;  %2304 = vmatmul.mubr.msk.f32.gmra.mxu0 %vm240_vm4, %v510_v32 }
 0x169   :  { %2280 = vmatprep.mubr.msk.f32.mxu1 %vm2553_vm2, %v2552_v10  ;;  %2333 = vmatprep.mubr.msk.f32.mxu0 %vm2553_vm2, %v2552_v10 }
 0x16b   :  { %v367_v33 = vpop.trf.xlu0  ;;  %v647_v34 = vpop.trf.xlu1 }
 0x16c   :  { %2281 = vmatmul.mubr.msk.f32.gmra.mxu1 %vm240_vm4, %v367_v33 }
 0x16d   :  { %2283 = vmatprep.mubr.msk.f32.mxu1 %vm2553_vm2, %v2552_v10 }
 0x16f   :  { %v368_v35 = vpop.trf.xlu0  ;;  %v648_v37 = vpop.trf.xlu1 }
 0x170   :  { %2284 = vmatmul.mubr.msk.f32.gmra.mxu1 %vm240_vm4, %v368_v35  ;;  %v180_v35 = vfloor.f32 %v175_v23 }
 0x171   :  { %2286 = vmatprep.mubr.msk.f32.mxu1 %vm2553_vm2, %v2552_v10 }
 0x172   :  { %vm188_vm0 = vcmp.eq.f32.partialorder %v180_v35, %v187_v6 }
 0x173   :  { %v369_v36 = vpop.trf.xlu0  ;;  %v649_v38 = vpop.trf.xlu1  ;;  %vm2756_vm1 = vmand %vm188_vm0, %vm200_vm7  ;;  %vm1118_vm7 = vcmask 39943  }
 0x174   :  { %2287 = vmatmul.mubr.msk.f32.gmra.mxu1 %vm240_vm4, %v369_v36 }
 0x175   :  { %2308 = vmatprep.mubr.msk.f32.mxu1 %vm2553_vm2, %v2552_v10 }
 0x177   :  { %v650_v39 = vpop.trf.xlu1 }
 0x178   :  { %2309 = vmatmul.mubr.msk.f32.vlgmr.msra.gmra.mxu1 %vm240_vm4, %v647_v34 }
 0x179   :  { %2311 = vmatprep.mubr.msk.f32.mxu1 %vm2553_vm2, %v2552_v10 }
 0x17b   :  { %v651_v40 = vpop.trf.xlu1 }
 0x17c   :  { %2312 = vmatmul.mubr.msk.f32.gmra.mxu1 %vm240_vm4, %v648_v37 }
 0x17d   :  { %2314 = vmatprep.mubr.msk.f32.mxu1 %vm2553_vm2, %v2552_v10 }
 0x180   :  { %2315 = vmatmul.mubr.msk.f32.gmra.mxu1 %vm240_vm4, %v649_v38 }
 0x181   :  { %2317 = vmatprep.mubr.msk.f32.mxu1 %vm2553_vm2, %v2552_v10 }
 0x184   :  { %2318 = vmatmul.mubr.msk.f32.gmra.mxu1 %vm240_vm4, %v650_v39 }
 0x185   :  { %2320 = vmatprep.mubr.msk.f32.mxu1 %vm2553_vm2, %v2552_v10 }
 0x188   :  { %2321 = vmatmul.mubr.msk.f32.gmra.mxu1 %vm240_vm4, %v651_v40 }
 0x189   :  { %2346 = vmatprep.mubr.msk.f32.mxu1 %vm2553_vm2, %v2552_v10 }
 0x210   :  { %v2704_v57 = vpop.f32.mrf.mxu1 }
 0x211   :  { %v2765_v54 = vsel %vm2756_vm1, %v2704_v57, -inf }
 0x212   :  { %v2259_v0 = vpop.f32.mrf.mxu1  ;;  %v803_v59 = vsel %vm802_vm11, %v2765_v54, -inf }
 0x214   :  { %v330_v5 = vpop.f32.mrf.mxu1 }
 0x215   :  { %v2753_v47 = vsel %vm2745_vm15, %v330_v5, -inf }
 0x216   :  { %v2262_v12 = vpop.f32.mrf.mxu1  ;;  %v806_v52 = vsel %vm802_vm11, %v2753_v47, -inf }
 0x218   :  { %v335_v17 = vpop.f32.mrf.mxu1  ;;  %v2711_v18 = vpop.f32.mrf.mxu0 }
 0x219   :  { %v2742_v40 = vsel %vm2730_vm13, %v335_v17, -inf  ;;  %v2814_v23 = vsel %vm2756_vm1, %v2711_v18, -inf }
 0x21a   :  { %v2265_v20 = vpop.f32.mrf.mxu1  ;;  %v2293_v22 = vpop.f32.mrf.mxu0  ;;  %v809_v45 = vsel %vm802_vm11, %v2742_v40, -inf }
 0x21c   :  { %v340_v24 = vpop.f32.mrf.mxu1  ;;  %v612_v25 = vpop.f32.mrf.mxu0 }
 0x21d   :  { %v2720_v27 = vsel %vm2714_vm8, %v340_v24, -inf  ;;  %v2801_v16 = vsel %vm2745_vm15, %v612_v25, -inf }
 0x21e   :  { %v2268_v28 = vpop.f32.mrf.mxu1  ;;  %v812_v29 = vsel %vm802_vm11, %v2720_v27, -inf  ;;  %v2296_v31 = vpop.f32.mrf.mxu0  ;;  %v836_v22 = vsel %vm802_vm11, %v2801_v16, -inf }
 0x21f   :  { %813 = vmax.xlane.f32.xlu1 %v812_v29  ;;  %v833_v29 = vsel %vm802_vm11, %v2814_v23, -inf }
 0x220   :  { %v345_v33 = vpop.f32.mrf.mxu1  ;;  %v617_v34 = vpop.f32.mrf.mxu0 }
 0x221   :  { %v2736_v36 = vsel %vm2725_vm12, %v345_v33, -inf  ;;  %v2789_v6 = vsel %vm2730_vm13, %v617_v34, -inf }
 0x222   :  { %v2271_v37 = vpop.f32.mrf.mxu1  ;;  %v815_v38 = vsel %vm802_vm11, %v2736_v36, -inf  ;;  %v2299_v39 = vpop.f32.mrf.mxu0  ;;  %v839_v13 = vsel %vm802_vm11, %v2789_v6, -inf }
 0x223   :  { %816 = vmax.xlane.f32.xlu0 %v815_v38 }
 0x224   :  { %v466_v42 = vpop.f32.mrf.mxu1  ;;  %v622_v43 = vpop.f32.mrf.mxu0 }
 0x225   :  { %v2777_v57 = vsel %vm2714_vm8, %v622_v43, -inf  ;;  %v2826_v31 = vsel %vm2756_vm1, %v466_v42, -inf }
 0x226   :  { %v2276_v44 = vpop.f32.mrf.mxu1  ;;  %v2302_v46 = vpop.f32.mrf.mxu0  ;;  %v842_v5 = vsel %vm802_vm11, %v2777_v57, -inf  ;;  %v818_v34 = vsel %vm802_vm11, %v2826_v31, -inf }
 0x227   :  { %810 = vmax.xlane.f32.xlu0 %v809_v45 }
 0x228   :  { %v471_v49 = vpop.f32.mrf.mxu1  ;;  %v627_v50 = vpop.f32.mrf.mxu0 }
 0x229   :  { %v2769_v56 = vsel %vm2725_vm12, %v627_v50, -inf  ;;  %v2818_v24 = vsel %vm2745_vm15, %v471_v49, -inf }
 0x22a   :  { %v2279_v51 = vpop.f32.mrf.mxu1  ;;  %v2305_v53 = vpop.f32.mrf.mxu0  ;;  %v845_v61 = vsel %vm802_vm11, %v2769_v56, -inf  ;;  %v821_v28 = vsel %vm802_vm11, %v2818_v24, -inf }
 0x22b   :  { %807 = vmax.xlane.f32.xlu0 %v806_v52 }
 0x22c   :  { %v476_v55 = vpop.f32.mrf.mxu1 }
 0x22d   :  { %v2805_v17 = vsel %vm2730_vm13, %v476_v55, -inf }
 0x22e   :  { %v2282_v58 = vpop.f32.mrf.mxu1  ;;  %v824_v20 = vsel %vm802_vm11, %v2805_v17, -inf }
 0x22f   :  { %804 = vmax.xlane.f32.xlu0 %v803_v59 }
 0x230   :  { %v481_v60 = vpop.f32.mrf.mxu1 }
 0x231   :  { %v2793_v7 = vsel %vm2714_vm8, %v481_v60, -inf }
 0x232   :  { %v2285_v62 = vpop.f32.mrf.mxu1  ;;  %v827_v12 = vsel %vm802_vm11, %v2793_v7, -inf }
 0x233   :  { %846 = vmax.xlane.f32.xlu0 %v845_v61 }
 0x234   :  { %v486_v0 = vpop.f32.mrf.mxu1 }
 0x235   :  { %v2781_v2 = vsel %vm2725_vm12, %v486_v0, -inf }
 0x236   :  { %v2288_v3 = vpop.f32.mrf.mxu1  ;;  %v830_v4 = vsel %vm802_vm11, %v2781_v2, -inf }
 0x237   :  { %831 = vmax.xlane.f32.xlu1 %v830_v4  ;;  %843 = vmax.xlane.f32.xlu0 %v842_v5 }
 0x238   :  { %v748_v8 = vpop.f32.mrf.mxu1 }
 0x239   :  { %v2856_v46 = vsel %vm2756_vm1, %v748_v8, -inf  ;;  %vm1718_vm1 = vcmask 1041408  }
 0x23a   :  { %v2310_v9 = vpop.f32.mrf.mxu1  ;;  %v848_v32 = vsel %vm802_vm11, %v2856_v46, -inf }
 0x23b   :  { %828 = vmax.xlane.f32.xlu1 %v827_v12  ;;  %840 = vmax.xlane.f32.xlu0 %v839_v13 }
 0x23c   :  { %v753_v1 = vpop.f32.mrf.mxu1 }
 0x23d   :  { %v2850_v45 = vsel %vm2745_vm15, %v753_v1, -inf  ;;  %vm1216_vm15 = vcmask 34816  }
 0x23e   :  { %v2313_v19 = vpop.f32.mrf.mxu1  ;;  %v851_v21 = vsel %vm802_vm11, %v2850_v45, -inf }
 0x23f   :  { %825 = vmax.xlane.f32.xlu1 %v824_v20  ;;  %837 = vmax.xlane.f32.xlu0 %v836_v22 }
 0x240   :  { %v758_v25 = vpop.f32.mrf.mxu1 }
 0x241   :  { %v2844_v44 = vsel %vm2730_vm13, %v758_v25, -inf  ;;  %vm1159_vm13 = vcmask 32768  }
 0x242   :  { %v2316_v26 = vpop.f32.mrf.mxu1  ;;  %v854_v30 = vsel %vm802_vm11, %v2844_v44, -inf }
 0x243   :  { %822 = vmax.xlane.f32.xlu1 %v821_v28  ;;  %834 = vmax.xlane.f32.xlu0 %v833_v29 }
 0x244   :  { %v763_v18 = vpop.f32.mrf.mxu1 }
 0x245   :  { %v2838_v42 = vsel %vm2714_vm8, %v763_v18, -inf  ;;  %vm1120_vm8 = vcmask 35840  }
 0x246   :  { %v2319_v33 = vpop.f32.mrf.mxu1  ;;  %v857_v43 = vsel %vm802_vm11, %v2838_v42, -inf }
 0x247   :  { %819 = vmax.xlane.f32.xlu1 %v818_v34 }
 0x248   :  { %v768_v35 = vpop.f32.mrf.mxu1 }
 0x249   :  { %v2832_v37 = vsel %vm2725_vm12, %v768_v35, -inf  ;;  %vm1214_vm12 = vcmask 39942  }
 0x24a   :  { %v2322_v38 = vpop.f32.mrf.mxu1  ;;  %v860_v39 = vsel %vm802_vm11, %v2832_v37, -inf }
 0x24b   :  { %861 = vmax.xlane.f32.xlu1 %v860_v39 }
 0x24f   :  { %858 = vmax.xlane.f32.xlu1 %v857_v43 }
 0x253   :  { %855 = vmax.xlane.f32.xlu1 %v854_v30 }
 0x257   :  { %852 = vmax.xlane.f32.xlu1 %v851_v21 }
 0x25b   :  { %849 = vmax.xlane.f32.xlu1 %v848_v32 }
 0x2a8   :  { %v814_v49 = vpop.xlane.xlu1 %813 }
 0x2a9   :  { %v866_v50 = vsub.f32 %v2720_v27, %v814_v49 }
 0x2ab   :  { %v889_v52 = vmul.f32 1.442695, %v866_v50 }
 0x2ac   :  { %v817_v51 = vpop.xlane.xlu0 %816 }
 0x2ad   :  { %v867_v41 = vsub.f32 %v2736_v36, %v817_v51 }
 0x2af   :  { %v891_v53 = vmul.f32 1.442695, %v867_v41 }
 0x2b0   :  { %v811_v55 = vpop.xlane.xlu0 %810 }
 0x2b1   :  { %2433 = vpow2.f32 %v891_v53  ;;  %v865_v58 = vsub.f32 %v2742_v40, %v811_v55 }
 0x2b2   :  { %2435 = vpow2.f32 %v889_v52 }
 0x2b3   :  { %v887_v48 = vmul.f32 1.442695, %v865_v58 }
 0x2b4   :  { %v808_v59 = vpop.xlane.xlu0 %807 }
 0x2b5   :  { %v864_v60 = vsub.f32 %v2753_v47, %v808_v59  ;;  %2437 = vpow2.f32 %v887_v48 }
 0x2b7   :  { %v885_v61 = vmul.f32 1.442695, %v864_v60 }
 0x2b8   :  { %v805_v62 = vpop.xlane.xlu0 %804 }
 0x2b9   :  { %v863_v0 = vsub.f32 %v2765_v54, %v805_v62  ;;  %2439 = vpow2.f32 %v885_v61 }
 0x2bb   :  { %v883_v27 = vmul.f32 1.442695, %v863_v0 }
 0x2bc   :  { %v847_v3 = vpop.xlane.xlu0 %846 }
 0x2bd   :  { %v877_v36 = vsub.f32 %v2769_v56, %v847_v3  ;;  %2441 = vpow2.f32 %v883_v27 }
 0x2be   :  { %v2866_v4 = vpop.eup %2433 }
 0x2bf   :  { %v911_v5 = vmul.f32 1.442695, %v877_v36  ;;  %v935_v40 = vsel %vm802_vm11, %v2866_v4, 0.0  ;;  %v2870_v8 = vpop.eup %2435 }
 0x2c0   :  { %v832_v47 = vpop.xlane.xlu1 %831  ;;  %936 = vadd.xlane.f32.xlu0 %v935_v40  ;;  %v844_v9 = vpop.xlane.xlu0 %843  ;;  %v932_v56 = vsel %vm802_vm11, %v2870_v8, 0.0 }
 0x2c1   :  { %v872_v12 = vsub.f32 %v2781_v2, %v832_v47  ;;  %v876_v54 = vsub.f32 %v2777_v57, %v844_v9  ;;  %2443 = vpow2.f32 %v911_v5 }
 0x2c2   :  { %v2876_v19 = vpop.eup %2437 }
 0x2c3   :  { %v901_v13 = vmul.f32 1.442695, %v872_v12  ;;  %v909_v1 = vmul.f32 1.442695, %v876_v54  ;;  %v929_v57 = vsel %vm802_vm11, %v2876_v19, 0.0 }
 0x2c4   :  { %v829_v20 = vpop.xlane.xlu1 %828  ;;  %933 = vadd.xlane.f32.xlu0 %v932_v56  ;;  %v841_v22 = vpop.xlane.xlu0 %840 }
 0x2c5   :  { %2445 = vpow2.f32 %v901_v13  ;;  %v871_v25 = vsub.f32 %v2793_v7, %v829_v20  ;;  %v875_v26 = vsub.f32 %v2789_v6, %v841_v22 }
 0x2c6   :  { %2447 = vpow2.f32 %v909_v1  ;;  %v2882_v29 = vpop.eup %2439 }
 0x2c7   :  { %v899_v2 = vmul.f32 1.442695, %v871_v25  ;;  %v907_v28 = vmul.f32 1.442695, %v875_v26  ;;  %v926_v6 = vsel %vm802_vm11, %v2882_v29, 0.0 }
 0x2c8   :  { %v826_v18 = vpop.xlane.xlu1 %825  ;;  %930 = vadd.xlane.f32.xlu0 %v929_v57  ;;  %v838_v33 = vpop.xlane.xlu0 %837 }
 0x2c9   :  { %2449 = vpow2.f32 %v899_v2  ;;  %v870_v34 = vsub.f32 %v2805_v17, %v826_v18  ;;  %v874_v35 = vsub.f32 %v2801_v16, %v838_v33 }
 0x2ca   :  { %2451 = vpow2.f32 %v907_v28  ;;  %v2888_v39 = vpop.eup %2441 }
 0x2cb   :  { %v897_v7 = vmul.f32 1.442695, %v870_v34  ;;  %v905_v38 = vmul.f32 1.442695, %v874_v35  ;;  %v923_v16 = vsel %vm802_vm11, %v2888_v39, 0.0 }
 0x2cc   :  { %v823_v43 = vpop.xlane.xlu1 %822  ;;  %927 = vadd.xlane.f32.xlu0 %v926_v6  ;;  %v835_v30 = vpop.xlane.xlu0 %834 }
 0x2cd   :  { %2453 = vpow2.f32 %v897_v7  ;;  %v869_v21 = vsub.f32 %v2818_v24, %v823_v43  ;;  %v873_v32 = vsub.f32 %v2814_v23, %v835_v30  ;;  %v2003_v30 = vld [vmem:[%s3433_s4] sm:$0xff] }
 0x2ce   :  { %2455 = vpow2.f32 %v905_v38  ;;  %v2894_v50 = vpop.eup %2443 }
 0x2cf   :  { %v895_v17 = vmul.f32 1.442695, %v869_v21  ;;  %v903_v49 = vmul.f32 1.442695, %v873_v32  ;;  %v965_v24 = vsel %vm802_vm11, %v2894_v50, 0.0  ;;  %v2006_v21 = vld [vmem:[%s3433_s4 + $0x18] sm:$0xff] }
 0x2d0   :  { %v820_v51 = vpop.xlane.xlu1 %819  ;;  %924 = vadd.xlane.f32.xlu0 %v923_v16  ;;  %v2004_v32 = vld [vmem:[%s3433_s4 + $0x8] sm:$0xff] }
 0x2d1   :  { %2457 = vpow2.f32 %v895_v17  ;;  %v868_v41 = vsub.f32 %v2826_v31, %v820_v51  ;;  %v2005_v17 = vld [vmem:[%s3433_s4 + $0x10] sm:$0xff]  ;;  %s2554_s4 = smov 123  }
 0x2d2   :  { %v2897_v52 = vpop.eup %2445  ;;  %2459 = vpow2.f32 %v903_v49 }
 0x2d3   :  { %v893_v53 = vmul.f32 1.442695, %v868_v41  ;;  %v950_v23 = vsel %vm802_vm11, %v2897_v52, 0.0  ;;  %v2903_v55 = vpop.eup %2447 }
 0x2d4   :  { %951 = vadd.xlane.f32.xlu1 %v950_v23  ;;  %v862_v58 = vpop.xlane.xlu1 %861  ;;  %966 = vadd.xlane.f32.xlu0 %v965_v24  ;;  %v962_v61 = vsel %vm802_vm11, %v2903_v55, 0.0 }
 0x2d5   :  { %2461 = vpow2.f32 %v893_v53  ;;  %v882_v48 = vsub.f32 %v2832_v37, %v862_v58 }
 0x2d6   :  { %v2906_v59 = vpop.eup %2449 }
 0x2d7   :  { %v921_v31 = vmul.f32 1.442695, %v882_v48  ;;  %v947_v60 = vsel %vm802_vm11, %v2906_v59, 0.0  ;;  %v2912_v62 = vpop.eup %2451 }
 0x2d8   :  { %948 = vadd.xlane.f32.xlu1 %v947_v60  ;;  %v859_v0 = vpop.xlane.xlu1 %858  ;;  %963 = vadd.xlane.f32.xlu0 %v962_v61  ;;  %v959_v5 = vsel %vm802_vm11, %v2912_v62, 0.0 }
 0x2d9   :  { %2463 = vpow2.f32 %v921_v31  ;;  %v881_v27 = vsub.f32 %v2838_v42, %v859_v0 }
 0x2da   :  { %v2915_v3 = vpop.eup %2453 }
 0x2db   :  { %v919_v37 = vmul.f32 1.442695, %v881_v27  ;;  %v944_v36 = vsel %vm802_vm11, %v2915_v3, 0.0  ;;  %v2921_v40 = vpop.eup %2455 }
 0x2dc   :  { %945 = vadd.xlane.f32.xlu1 %v944_v36  ;;  %v856_v47 = vpop.xlane.xlu1 %855  ;;  %960 = vadd.xlane.f32.xlu0 %v959_v5  ;;  %v956_v13 = vsel %vm802_vm11, %v2921_v40, 0.0 }
 0x2dd   :  { %2465 = vpow2.f32 %v919_v37  ;;  %v880_v9 = vsub.f32 %v2844_v44, %v856_v47 }
 0x2de   :  { %v2924_v12 = vpop.eup %2457 }
 0x2df   :  { %v917_v42 = vmul.f32 1.442695, %v880_v9  ;;  %v941_v54 = vsel %vm802_vm11, %v2924_v12, 0.0  ;;  %v2930_v1 = vpop.eup %2459 }
 0x2e0   :  { %942 = vadd.xlane.f32.xlu1 %v941_v54  ;;  %v853_v56 = vpop.xlane.xlu1 %852  ;;  %957 = vadd.xlane.f32.xlu0 %v956_v13  ;;  %v953_v26 = vsel %vm802_vm11, %v2930_v1, 0.0 }
 0x2e1   :  { %2467 = vpow2.f32 %v917_v42  ;;  %v879_v20 = vsub.f32 %v2850_v45, %v853_v56 }
 0x2e2   :  { %v2933_v22 = vpop.eup %2461 }
 0x2e3   :  { %v915_v44 = vmul.f32 1.442695, %v879_v20  ;;  %v938_v25 = vsel %vm802_vm11, %v2933_v22, 0.0 }
 0x2e4   :  { %939 = vadd.xlane.f32.xlu1 %v938_v25  ;;  %v850_v2 = vpop.xlane.xlu1 %849  ;;  %954 = vadd.xlane.f32.xlu0 %v953_v26 }
 0x2e5   :  { %2469 = vpow2.f32 %v915_v44  ;;  %v878_v28 = vsub.f32 %v2856_v46, %v850_v2 }
 0x2e6   :  { %v2940_v57 = vpop.eup %2463 }
 0x2e7   :  { %v913_v18 = vmul.f32 1.442695, %v878_v28  ;;  %v980_v45 = vsel %vm802_vm11, %v2940_v57, 0.0 }
 0x2e8   :  { %981 = vadd.xlane.f32.xlu1 %v980_v45 }
 0x2e9   :  { %2471 = vpow2.f32 %v913_v18 }
 0x2ea   :  { %v2944_v33 = vpop.eup %2465 }
 0x2eb   :  { %v977_v34 = vsel %vm802_vm11, %v2944_v33, 0.0 }
 0x2ec   :  { %978 = vadd.xlane.f32.xlu1 %v977_v34 }
 0x2ee   :  { %v2948_v35 = vpop.eup %2467 }
 0x2ef   :  { %v974_v7 = vsel %vm802_vm11, %v2948_v35, 0.0 }
 0x2f0   :  { %975 = vadd.xlane.f32.xlu1 %v974_v7 }
 0x2f2   :  { %v2952_v46 = vpop.eup %2469 }
 0x2f3   :  { %v971_v38 = vsel %vm802_vm11, %v2952_v46, 0.0 }
 0x2f4   :  { %972 = vadd.xlane.f32.xlu1 %v971_v38 }
 0x2f6   :  { %v2956_v6 = vpop.eup %2471 }
 0x2f7   :  { %v968_v43 = vsel %vm802_vm11, %v2956_v6, 0.0 }
 0x2f8   :  { %969 = vadd.xlane.f32.xlu1 %v968_v43 }
 0x2fa   :  { %2009 = vperm.xlu0 %2416, %v2003_v30  }
 0x2fe   :  { %2024 = vperm.xlu0 %2416, %v2006_v21  }
 0x309   :  { %2014 = vperm.xlu1 %2417, %v2004_v32  }
 0x30d   :  { %2019 = vperm.xlu1 %2417, %v2005_v17  }
 0x349   :  { %v937_v49 = vpop.xlane.xlu0 %936 }
 0x34a   :  { %2473 = vrcp.f32 %v937_v49 }
 0x34d   :  { %v934_v16 = vpop.xlane.xlu0 %933 }
 0x34e   :  { %2475 = vrcp.f32 %v934_v16 }
 0x351   :  { %v931_v51 = vpop.xlane.xlu0 %930 }
 0x352   :  { %2477 = vrcp.f32 %v931_v51 }
 0x355   :  { %v928_v41 = vpop.xlane.xlu0 %927 }
 0x356   :  { %2479 = vrcp.f32 %v928_v41 }
 0x357   :  { %v2474_v53 = vpop.eup %2473 }
 0x358   :  { %v2973_v23 = vmul.f32 %v2474_v53, %v2866_v4 }
 0x359   :  { %v925_v24 = vpop.xlane.xlu0 %924 }
 0x35a   :  { %2481 = vrcp.f32 %v925_v24  ;;  %2324 = vmatpush3.xpose.msk.msra.mxu0 %vm802_vm11, %v2973_v23 }
 0x35b   :  { %v2476_v58 = vpop.eup %2475  ;;  %2325 = vmatprep.subr.mxu0 %v2552_v10 }
 0x35c   :  { %v2979_v48 = vmul.f32 %v2476_v58, %v2870_v8 }
 0x35d   :  { %v952_v31 = vpop.xlane.xlu1 %951  ;;  %v967_v60 = vpop.xlane.xlu0 %966 }
 0x35e   :  { %2483 = vrcp.f32 %v952_v31  ;;  %2326 = vmatpush3.xpose.msk.msra.mxu0 %vm802_vm11, %v2979_v48  ;;  %v2425_v31 = vld [vmem:[%s3432_s3] sm:$0xff]  }
 0x35f   :  { %v2478_v61 = vpop.eup %2477  ;;  %2485 = vrcp.f32 %v967_v60  ;;  %2327 = vmatprep.subr.mxu0 %v2552_v10 }
 0x360   :  { %v1005_v4 = vmul.f32 %v2478_v61, %v2876_v19 }
 0x361   :  { %v949_v0 = vpop.xlane.xlu1 %948  ;;  %v964_v27 = vpop.xlane.xlu0 %963 }
 0x362   :  { %2487 = vrcp.f32 %v949_v0  ;;  %2328 = vmatpush3.xpose.msk.msra.mxu0 %vm802_vm11, %v1005_v4 }
 0x363   :  { %v2480_v37 = vpop.eup %2479  ;;  %2489 = vrcp.f32 %v964_v27  ;;  %2329 = vmatprep.subr.mxu0 %v2552_v10 }
 0x364   :  { %v1004_v8 = vmul.f32 %v2480_v37, %v2882_v29  ;;  %v2429_v37 = vld [vmem:[%s3432_s3 + $0x20] sm:$0xff]  }
 0x365   :  { %v946_v36 = vpop.xlane.xlu1 %945  ;;  %v961_v5 = vpop.xlane.xlu0 %960 }
 0x366   :  { %2491 = vrcp.f32 %v946_v36  ;;  %1038 = vrot.lane.b32.xlu1 %v1004_v8, %s2554_s4  ;;  %2330 = vmatpush3.xpose.msk.msra.mxu0 %vm802_vm11, %v1004_v8 }
 0x367   :  { %v2482_v19 = vpop.eup %2481  ;;  %2493 = vrcp.f32 %v961_v5  ;;  %2331 = vmatprep.subr.mxu0 %v2552_v10 }
 0x368   :  { %v1003_v47 = vmul.f32 %v2482_v19, %v2888_v39 }
 0x369   :  { %v943_v9 = vpop.xlane.xlu1 %942  ;;  %v958_v42 = vpop.xlane.xlu0 %957 }
 0x36a   :  { %2495 = vrcp.f32 %v943_v9  ;;  %1071 = vrot.lane.b32.xlu1 %v1004_v8, %s2555_s18  ;;  %1036 = vrot.lane.b32.xlu0 %v1003_v47, %s2554_s4  ;;  %1024 = vst.msk [vmem:[%s3435_s6] sm:$0x1f] %vm1023_vm3, %v1003_v47 }
 0x36b   :  { %v2484_v29 = vpop.eup %2483  ;;  %2497 = vrcp.f32 %v958_v42  ;;  %2332 = vmatpush3.xpose.msk.msra.mxu0 %vm802_vm11, %v1003_v47 }
 0x36c   :  { %v2486_v54 = vpop.eup %2485  ;;  %2349 = vmatprep.subr.mxu0 %v2552_v10  ;;  %v3001_v39 = vmul.f32 %v2484_v29, %v2897_v52 }
 0x36d   :  { %v940_v13 = vpop.xlane.xlu1 %939  ;;  %v955_v56 = vpop.xlane.xlu0 %954  ;;  %v3004_v20 = vmul.f32 %v2486_v54, %v2894_v50 }
 0x36e   :  { %2499 = vrcp.f32 %v940_v13  ;;  %2334 = vmatmul.mubr.msk.f32.vlgmr.msra.gmra.mxu0 %vm802_vm11, %v2630_v15  ;;  %2337 = vmatpush3.xpose.msk.msra.mxu1 %vm802_vm11, %v3001_v39 }
 0x36f   :  { %v2488_v44 = vpop.eup %2487  ;;  %2501 = vrcp.f32 %v955_v56  ;;  %1093 = vrot.lane.b32.xlu1 %v1004_v8, %s2556_s21  ;;  %1095 = vrot.lane.b32.xlu0 %v1005_v4, %s2556_s21 }
 0x370   :  { %v2490_v52 = vpop.eup %2489  ;;  %2350 = vmatpush3.xpose.msk.msra.mxu0 %vm802_vm11, %v3004_v20  ;;  %2338 = vmatprep.subr.mxu1 %v2552_v10  ;;  %v3016_v50 = vmul.f32 %v2488_v44, %v2906_v59 }
 0x371   :  { %v982_v15 = vpop.xlane.xlu1 %981  ;;  %2351 = vmatprep.subr.mxu0 %v2552_v10  ;;  %v3020_v25 = vmul.f32 %v2490_v52, %v2903_v55  ;;  %2359 = vmatprep.mubr.msk.f32.mxu0 %vm2553_vm2, %v2552_v10 }
 0x372   :  { %2503 = vrcp.f32 %v982_v15  ;;  %2339 = vmatpush3.xpose.msk.msra.mxu1 %vm802_vm11, %v3016_v50 }
 0x373   :  { %v2492_v26 = vpop.eup %2491  ;;  %1132 = vrot.lane.b32.xlu0 %v1005_v4, %s2557_s22  ;;  %2340 = vmatprep.subr.mxu1 %v2552_v10 }
 0x374   :  { %v2494_v59 = vpop.eup %2493  ;;  %2352 = vmatpush3.xpose.msk.msra.mxu0 %vm802_vm11, %v3020_v25  ;;  %v3031_v55 = vmul.f32 %v2492_v26, %v2915_v3 }
 0x375   :  { %v979_v2 = vpop.xlane.xlu1 %978  ;;  %2353 = vmatprep.subr.mxu0 %v2552_v10  ;;  %v1015_v28 = vmul.f32 %v2494_v59, %v2912_v62 }
 0x376   :  { %2505 = vrcp.f32 %v979_v2  ;;  %2341 = vmatpush3.xpose.msk.msra.mxu1 %vm802_vm11, %v3031_v55 }
 0x377   :  { %v2496_v18 = vpop.eup %2495  ;;  %2342 = vmatprep.subr.mxu1 %v2552_v10 }
 0x378   :  { %v2498_v45 = vpop.eup %2497  ;;  %2354 = vmatpush3.xpose.msk.msra.mxu0 %vm802_vm11, %v1015_v28  ;;  %v3040_v34 = vmul.f32 %v2496_v18, %v2924_v12 }
 0x379   :  { %v976_v3 = vpop.xlane.xlu1 %975  ;;  %2355 = vmatprep.subr.mxu0 %v2552_v10  ;;  %v1014_v7 = vmul.f32 %v2498_v45, %v2921_v40 }
 0x37a   :  { %2507 = vrcp.f32 %v976_v3  ;;  %2343 = vmatpush3.xpose.msk.msra.mxu1 %vm802_vm11, %v3040_v34 }
 0x37b   :  { %v2500_v62 = vpop.eup %2499  ;;  %1046 = vrot.lane.b32.xlu0 %v1014_v7, %s2554_s4  ;;  %2344 = vmatprep.subr.mxu1 %v2552_v10 }
 0x37c   :  { %v2502_v38 = vpop.eup %2501  ;;  %2356 = vmatpush3.xpose.msk.msra.mxu0 %vm802_vm11, %v1014_v7  ;;  %v1008_v12 = vmul.f32 %v2500_v62, %v2933_v22 }
 0x37d   :  { %v973_v43 = vpop.xlane.xlu1 %972  ;;  %2357 = vmatprep.subr.mxu0 %v2552_v10  ;;  %v1013_v30 = vmul.f32 %v2502_v38, %v2930_v1 }
 0x37e   :  { %2509 = vrcp.f32 %v973_v43  ;;  %1025 = vst.msk [vmem:[%s3435_s6 + $0x8] sm:$0x1f] %vm1023_vm3, %v1008_v12  ;;  %2345 = vmatpush3.xpose.msk.msra.mxu1 %vm802_vm11, %v1008_v12 }
 0x37f   :  { %v2504_v40 = vpop.eup %2503  ;;  %1167 = vrot.lane.b32.xlu0 %v2979_v48, %s2558_s25  ;;  %1044 = vrot.lane.b32.xlu1 %v1013_v30, %s2554_s4  ;;  %1026 = vst.msk [vmem:[%s3435_s6 + $0x10] sm:$0x1f] %vm1023_vm3, %v1013_v30 }
 0x380   :  { %2358 = vmatpush3.xpose.msk.msra.mxu0 %vm802_vm11, %v1013_v30  ;;  %2362 = vmatprep.subr.mxu1 %v2552_v10  ;;  %v1022_v1 = vmul.f32 %v2504_v40, %v2940_v57 }
 0x381   :  { %2347 = vmatmul.mubr.msk.f32.vlgmr.msra.gmra.mxu1 %vm802_vm11, %v2627_v14  ;;  %v970_v22 = vpop.xlane.xlu1 %969 }
 0x382   :  { %2511 = vrcp.f32 %v970_v22  ;;  %2363 = vmatpush3.xpose.msk.msra.mxu1 %vm802_vm11, %v1022_v1  ;;  %2372 = vmatprep.mubr.msk.f32.mxu1 %vm2553_vm2, %v2552_v10  ;;  %vm1063_vm2 = vcmask 33792  }
 0x383   :  { %v2506_v21 = vpop.eup %2505  ;;  %2360 = vmatmul.mubr.msk.f32.vlgmr.msra.gmra.mxu0 %vm802_vm11, %v2709_v11  ;;  %1189 = vrot.lane.b32.xlu0 %v2979_v48, %s2559_s28 }
 0x384   :  { %1075 = vrot.lane.b32.xlu1 %v1014_v7, %s2555_s18  ;;  %2364 = vmatprep.subr.mxu1 %v2552_v10  ;;  %v1021_v14 = vmul.f32 %v2506_v21, %v2944_v33 }
 0x385   :  { %2377 = vmatprep.mubr.msk.bf16.mxu0 %vm240_vm4, %v2425_v31 }
 0x386   :  { %2365 = vmatpush3.xpose.msk.msra.mxu1 %vm802_vm11, %v1021_v14 }
 0x387   :  { %v2508_v57 = vpop.eup %2507  ;;  %1103 = vrot.lane.b32.xlu0 %v1015_v28, %s2556_s21  ;;  %2366 = vmatprep.subr.mxu1 %v2552_v10 }
 0x388   :  { %1101 = vrot.lane.b32.xlu1 %v1014_v7, %s2556_s21  ;;  %v1020_v11 = vmul.f32 %v2508_v57, %v2948_v35 }
 0x38a   :  { %2367 = vmatpush3.xpose.msk.msra.mxu1 %vm802_vm11, %v1020_v11 }
 0x38b   :  { %v2510_v32 = vpop.eup %2509  ;;  %1140 = vrot.lane.b32.xlu0 %v1015_v28, %s2557_s22  ;;  %2368 = vmatprep.subr.mxu1 %v2552_v10 }
 0x38c   :  { %1134 = vrot.lane.b32.xlu1 %v2979_v48, %s2557_s22  ;;  %v1019_v33 = vmul.f32 %v2510_v32, %v2952_v46 }
 0x38e   :  { %2369 = vmatpush3.xpose.msk.msra.mxu1 %vm802_vm11, %v1019_v33 }
 0x38f   :  { %v2512_v17 = vpop.eup %2511  ;;  %1224 = vrot.lane.b32.xlu0 %v2973_v23, %s2560_s29  ;;  %2370 = vmatprep.subr.mxu1 %v2552_v10  ;;  %v3146_v10 = vpop.permute.xlu1 %2014 }
 0x390   :  { %1191 = vrot.lane.b32.xlu1 %v2973_v23, %s2559_s28  ;;  %v1018_v35 = vmul.f32 %v2512_v17, %v2956_v6 }
 0x392   :  { %1027 = vst.msk [vmem:[%s3435_s6 + $0x18] sm:$0x1f] %vm1023_vm3, %v1018_v35  ;;  %2371 = vmatpush3.xpose.msk.msra.mxu1 %vm802_vm11, %v1018_v35 }
 0x393   :  { %1171 = vrot.lane.b32.xlu0 %v3020_v25, %s2558_s25  ;;  %v3150_v46 = vpop.permute.xlu1 %2019 }
 0x394   :  { %1040 = vrot.lane.b32.xlu1 %v1008_v12, %s2554_s4 }
 0x395   :  { %2373 = vmatmul.mubr.msk.f32.vlgmr.msra.gmra.mxu1 %vm802_vm11, %v2707_v63  ;;  %v3148_v63 = vpop.permute.xlu0 %2009 }
 0x396   :  { %2389 = vmatprep.mubr.msk.bf16.mxu1 %vm240_vm4, %v2429_v37 }
 0x397   :  { %1197 = vrot.lane.b32.xlu0 %v3020_v25, %s2559_s28 }
 0x398   :  { %1142 = vrot.lane.b32.xlu1 %v3020_v25, %s2557_s22 }
 0x399   :  { %v3152_v6 = vpop.permute.xlu0 %2024 }
 0x39b   :  { %1042 = vrot.lane.b32.xlu0 %v3040_v34, %s2554_s4 }
 0x39c   :  { %1097 = vrot.lane.b32.xlu1 %v3040_v34, %s2556_s21 }
 0x39f   :  { %1073 = vrot.lane.b32.xlu0 %v3040_v34, %s2555_s18 }
 0x3a0   :  { %1199 = vrot.lane.b32.xlu1 %v3004_v20, %s2559_s28 }
 0x3a3   :  { %1099 = vrot.lane.b32.xlu0 %v3031_v55, %s2556_s21 }
 0x3a4   :  { %1138 = vrot.lane.b32.xlu1 %v3016_v50, %s2557_s22 }
 0x3a7   :  { %1136 = vrot.lane.b32.xlu0 %v3031_v55, %s2557_s22 }
 0x3a8   :  { %1169 = vrot.lane.b32.xlu1 %v3016_v50, %s2558_s25 }
 0x3ab   :  { %1193 = vrot.lane.b32.xlu0 %v3016_v50, %s2559_s28 }
 0x3ac   :  { %1195 = vrot.lane.b32.xlu1 %v3001_v39, %s2559_s28 }
 0x3af   :  { %1050 = vrot.lane.b32.xlu0 %v1019_v33, %s2554_s4 }
 0x3b0   :  { %1226 = vrot.lane.b32.xlu1 %v3001_v39, %s2560_s29 }
 0x3b3   :  { %1077 = vrot.lane.b32.xlu0 %v1019_v33, %s2555_s18 }
 0x3b4   :  { %1048 = vrot.lane.b32.xlu1 %v1018_v35, %s2554_s4 }
 0x3b7   :  { %1144 = vrot.lane.b32.xlu0 %v1020_v11, %s2557_s22 }
 0x3b8   :  { %1105 = vrot.lane.b32.xlu1 %v1019_v33, %s2556_s21 }
 0x3bb   :  { %1201 = vrot.lane.b32.xlu0 %v1021_v14, %s2559_s28 }
 0x3bc   :  { %1107 = vrot.lane.b32.xlu1 %v1020_v11, %s2556_s21 }
 0x3bf   :  { %1228 = vrot.lane.b32.xlu0 %v3004_v20, %s2560_s29 }
 0x3c0   :  { %1146 = vrot.lane.b32.xlu1 %v1021_v14, %s2557_s22 }
 0x3c4   :  { %1173 = vrot.lane.b32.xlu1 %v1021_v14, %s2558_s25 }
 0x3c8   :  { %1203 = vrot.lane.b32.xlu1 %v1022_v1, %s2559_s28 }
 0x3cc   :  { %1230 = vrot.lane.b32.xlu1 %v1022_v1, %s2560_s29 }
 0x3d8   :  { %v1039_v49 = vpop.permute.xlu1 %1038 }
 0x3d9   :  { %2091 = vst.msk [vmem:[%s3435_s6 + $0x23] sm:$0x3] %vm1063_vm2, %v1039_v49 }
 0x3dc   :  { %v1072_v16 = vpop.permute.xlu1 %1071  ;;  %v1037_v51 = vpop.permute.xlu0 %1036 }
 0x3dd   :  { %2098 = vst.msk [vmem:[%s3435_s6 + $0x3e] sm:$0x7c] %vm1084_vm5, %v1072_v16 }
 0x3de   :  { %2090 = vst.msk [vmem:[%s3435_s6 + $0x1b] sm:$0xe0] %vm1061_vm6, %v1037_v51 }
 0x3e1   :  { %v1094_v41 = vpop.permute.xlu1 %1093  ;;  %v1096_v53 = vpop.permute.xlu0 %1095 }
 0x3e2   :  { %2102 = vst.msk [vmem:[%s3435_s6 + $0x59] sm:$0x80] %vm1118_vm7, %v1094_v41 }
 0x3e3   :  { %2103 = vst.msk [vmem:[%s3435_s6 + $0x61] sm:$0xf] %vm1120_vm8, %v1096_v53 }
 0x3e5   :  { %v1133_v23 = vpop.permute.xlu0 %1132 }
 0x3e6   :  { %2110 = vst.msk [vmem:[%s3435_s6 + $0x7c] sm:$0xf0] %vm1157_vm9, %v1133_v23 }
 0x3ed   :  { %v1047_v24 = vpop.permute.xlu0 %1046 }
 0x3ee   :  { %2095 = vst.msk [vmem:[%s3435_s6 + $0x33] sm:$0x3] %vm1063_vm2, %v1047_v24 }
 0x3f1   :  { %v1045_v58 = vpop.permute.xlu1 %1044  ;;  %v1168_v48 = vpop.permute.xlu0 %1167 }
 0x3f2   :  { %2094 = vst.msk [vmem:[%s3435_s6 + $0x2b] sm:$0xe0] %vm1061_vm6, %v1045_v58 }
 0x3f3   :  { %2118 = vst.msk [vmem:[%s3435_s6 + $0x9f] sm:$0x3e] %vm1180_vm10, %v1168_v48 }
 0x3f5   :  { %v1190_v60 = vpop.permute.xlu0 %1189 }
 0x3f6   :  { %v1076_v61 = vpop.permute.xlu1 %1075  ;;  %2122 = vst.msk [vmem:[%s3435_s6 + $0xba] sm:$0xc0] %vm1214_vm12, %v1190_v60 }
 0x3f7   :  { %2100 = vst.msk [vmem:[%s3435_s6 + $0x4e] sm:$0x7c] %vm1084_vm5, %v1076_v61 }
 0x3f9   :  { %v1104_v4 = vpop.permute.xlu0 %1103 }
 0x3fa   :  { %v1102_v0 = vpop.permute.xlu1 %1101  ;;  %2107 = vst.msk [vmem:[%s3435_s6 + $0x71] sm:$0xf] %vm1120_vm8, %v1104_v4 }
 0x3fb   :  { %2106 = vst.msk [vmem:[%s3435_s6 + $0x69] sm:$0x80] %vm1118_vm7, %v1102_v0 }
 0x3fd   :  { %v1141_v27 = vpop.permute.xlu0 %1140 }
 0x3fe   :  { %v1135_v8 = vpop.permute.xlu1 %1134  ;;  %2114 = vst.msk [vmem:[%s3435_s6 + $0x8c] sm:$0xf0] %vm1157_vm9, %v1141_v27 }
 0x3ff   :  { %2111 = vst.msk [vmem:[%s3435_s6 + $0x84] sm:$0x1] %vm1159_vm13, %v1135_v8 }
 0x401   :  { %v1225_v36 = vpop.permute.xlu0 %1224 }
 0x402   :  { %v1192_v5 = vpop.permute.xlu1 %1191  ;;  %2130 = vst.msk [vmem:[%s3435_s6 + $0xdd] sm:$0xf8] %vm1237_vm14, %v1225_v36 }
 0x403   :  { %2123 = vst.msk [vmem:[%s3435_s6 + $0xc2] sm:$0x7] %vm1216_vm15, %v1192_v5 }
 0x405   :  { %v1172_v19 = vpop.permute.xlu0 %1171 }
 0x406   :  { %v1041_v47 = vpop.permute.xlu1 %1040  ;;  %2120 = vst.msk [vmem:[%s3435_s6 + $0xaf] sm:$0x3e] %vm1180_vm10, %v1172_v19 }
 0x407   :  { %2092 = vst.msk [vmem:[%s3435_s6 + $0x23] sm:$0xe0] %vm1061_vm6, %v1041_v47 }
 0x409   :  { %v1198_v9 = vpop.permute.xlu0 %1197 }
 0x40a   :  { %v1143_v42 = vpop.permute.xlu1 %1142  ;;  %2126 = vst.msk [vmem:[%s3435_s6 + $0xca] sm:$0xc0] %vm1214_vm12, %v1198_v9 }
 0x40b   :  { %2115 = vst.msk [vmem:[%s3435_s6 + $0x94] sm:$0x1] %vm1159_vm13, %v1143_v42 }
 0x40d   :  { %v1043_v29 = vpop.permute.xlu0 %1042 }
 0x40e   :  { %v1098_v54 = vpop.permute.xlu1 %1097  ;;  %2093 = vst.msk [vmem:[%s3435_s6 + $0x2b] sm:$0x3] %vm1063_vm2, %v1043_v29 }
 0x40f   :  { %2104 = vst.msk [vmem:[%s3435_s6 + $0x61] sm:$0x80] %vm1118_vm7, %v1098_v54 }
 0x411   :  { %v1074_v39 = vpop.permute.xlu0 %1073 }
 0x412   :  { %v1200_v13 = vpop.permute.xlu1 %1199  ;;  %2099 = vst.msk [vmem:[%s3435_s6 + $0x46] sm:$0x7c] %vm1084_vm5, %v1074_v39 }
 0x413   :  { %2127 = vst.msk [vmem:[%s3435_s6 + $0xd2] sm:$0x7] %vm1216_vm15, %v1200_v13 }
 0x415   :  { %v1100_v56 = vpop.permute.xlu0 %1099 }
 0x416   :  { %v1139_v20 = vpop.permute.xlu1 %1138  ;;  %2105 = vst.msk [vmem:[%s3435_s6 + $0x69] sm:$0xf] %vm1120_vm8, %v1100_v56 }
 0x417   :  { %2113 = vst.msk [vmem:[%s3435_s6 + $0x8c] sm:$0x1] %vm1159_vm13, %v1139_v20 }
 0x419   :  { %v1137_v44 = vpop.permute.xlu0 %1136 }
 0x41a   :  { %v1170_v52 = vpop.permute.xlu1 %1169  ;;  %2112 = vst.msk [vmem:[%s3435_s6 + $0x84] sm:$0xf0] %vm1157_vm9, %v1137_v44 }
 0x41b   :  { %2119 = vst.msk [vmem:[%s3435_s6 + $0xa7] sm:$0x3e] %vm1180_vm10, %v1170_v52 }
 0x41d   :  { %v1194_v50 = vpop.permute.xlu0 %1193 }
 0x41e   :  { %v1196_v15 = vpop.permute.xlu1 %1195  ;;  %2124 = vst.msk [vmem:[%s3435_s6 + $0xc2] sm:$0xc0] %vm1214_vm12, %v1194_v50 }
 0x41f   :  { %2125 = vst.msk [vmem:[%s3435_s6 + $0xca] sm:$0x7] %vm1216_vm15, %v1196_v15 }
 0x421   :  { %v1051_v25 = vpop.permute.xlu0 %1050 }
 0x422   :  { %v1227_v26 = vpop.permute.xlu1 %1226  ;;  %2097 = vst.msk [vmem:[%s3435_s6 + $0x3b] sm:$0x3] %vm1063_vm2, %v1051_v25 }
 0x423   :  { %2131 = vst.msk [vmem:[%s3435_s6 + $0xe5] sm:$0xf8] %vm1237_vm14, %v1227_v26 }
 0x425   :  { %v1078_v59 = vpop.permute.xlu0 %1077 }
 0x426   :  { %v1049_v55 = vpop.permute.xlu1 %1048  ;;  %2101 = vst.msk [vmem:[%s3435_s6 + $0x56] sm:$0x7c] %vm1084_vm5, %v1078_v59 }
 0x427   :  { %2096 = vst.msk [vmem:[%s3435_s6 + $0x33] sm:$0xe0] %vm1061_vm6, %v1049_v55 }
 0x429   :  { %v1145_v2 = vpop.permute.xlu0 %1144 }
 0x42a   :  { %v1106_v28 = vpop.permute.xlu1 %1105  ;;  %2116 = vst.msk [vmem:[%s3435_s6 + $0x94] sm:$0xf0] %vm1157_vm9, %v1145_v2 }
 0x42b   :  { %2108 = vst.msk [vmem:[%s3435_s6 + $0x71] sm:$0x80] %vm1118_vm7, %v1106_v28 }
 0x42d   :  { %v1202_v18 = vpop.permute.xlu0 %1201 }
 0x42e   :  { %v1108_v45 = vpop.permute.xlu1 %1107  ;;  %2128 = vst.msk [vmem:[%s3435_s6 + $0xd2] sm:$0xc0] %vm1214_vm12, %v1202_v18  ;;  %v3314_v34 = vpop.f32.mrf.mxu0 }
 0x42f   :  { %2109 = vst.msk [vmem:[%s3435_s6 + $0x79] sm:$0xf] %vm1120_vm8, %v1108_v45  ;;  %v3321_v3 = vmul.f32 0.70710677, %v3314_v34 }
 0x430   :  { %v2335_v7 = vpop.f32.mrf.mxu0 }
 0x431   :  { %v1582_v62 = vand.u32 2147483647, %v3321_v3  ;;  %v1229_v38 = vpop.permute.xlu0 %1228  ;;  %vm1662_vm0 = vcmp.ge.f32.partialorder %v3321_v3, 0.0  ;;  %v1574_v7 = vmul.f32 0.5, %v3314_v34  ;;  %v2426_v34 = vld [vmem:[%s3432_s3 + $0x8] sm:$0xff]  }
 0x432   :  { %v1147_v12 = vpop.permute.xlu1 %1146  ;;  %2132 = vst.msk [vmem:[%s3435_s6 + $0xed] sm:$0xf8] %vm1237_vm14, %v1229_v38 }
 0x433   :  { %v1586_v43 = vmul.f32 0.3275911, %v1582_v62  ;;  %2117 = vst.msk [vmem:[%s3435_s6 + $0x9c] sm:$0x1] %vm1159_vm13, %v1147_v12  ;;  %v1638_v22 = vsub.f32 0.0, %v1582_v62 }
 0x435   :  { %v1590_v30 = vadd.f32 1.0, %v1586_v43  ;;  %v1642_v14 = vmul.f32 %v1638_v22, %v1582_v62 }
 0x436   :  { %v1174_v40 = vpop.permute.xlu1 %1173 }
 0x437   :  { %2513 = vrcp.f32 %v1590_v30  ;;  %2121 = vst.msk [vmem:[%s3435_s6 + $0xb7] sm:$0x3e] %vm1180_vm10, %v1174_v40  ;;  %v1646_v51 = vmul.f32 1.442695, %v1642_v14 }
 0x439   :  { %2515 = vpow2.f32 %v1646_v51 }
 0x43a   :  { %v1204_v1 = vpop.permute.xlu1 %1203 }
 0x43b   :  { %2129 = vst.msk [vmem:[%s3435_s6 + $0xda] sm:$0x7] %vm1216_vm15, %v1204_v1 }
 0x43e   :  { %v1231_v21 = vpop.permute.xlu1 %1230 }
 0x43f   :  { %2133 = vst.msk [vmem:[%s3435_s6 + $0xf5] sm:$0xf8] %vm1237_vm14, %v1231_v21 }
 0x441   :  { %v3344_v57 = vpop.f32.mrf.mxu1 }
 0x442   :  { %v3347_v11 = vmul.f32 0.70710677, %v3344_v57 }
 0x443   :  { %v3349_v32 = vpop.f32.mrf.mxu0  ;;  %v2348_v33 = vpop.f32.mrf.mxu1 }
 0x444   :  { %v2514_v17 = vpop.eup %2513  ;;  %v1583_v35 = vand.u32 2147483647, %v3347_v11  ;;  %v3353_v49 = vmul.f32 0.70710677, %v3349_v32  ;;  %vm1663_vm3 = vcmp.ge.f32.partialorder %v3347_v11, 0.0 }
 0x445   :  { %v1602_v16 = vmul.f32 1.0614054, %v2514_v17  ;;  %v2361_v41 = vpop.f32.mrf.mxu0 }
 0x446   :  { %v1587_v53 = vmul.f32 0.3275911, %v1583_v35  ;;  %v1584_v23 = vand.u32 2147483647, %v3353_v49  ;;  %v1639_v27 = vsub.f32 0.0, %v1583_v35  ;;  %v2516_v9 = vpop.eup %2515  ;;  %vm1664_vm2 = vcmp.ge.f32.partialorder %v3353_v49, 0.0 }
 0x447   :  { %v1606_v24 = vadd.f32 -1.4531521, %v1602_v16 }
 0x448   :  { %v1591_v58 = vadd.f32 1.0, %v1587_v53  ;;  %v1588_v48 = vmul.f32 0.3275911, %v1584_v23  ;;  %v1640_v36 = vsub.f32 0.0, %v1584_v23  ;;  %v1643_v5 = vmul.f32 %v1639_v27, %v1583_v35  ;;  %v2427_v35 = vld [vmem:[%s3432_s3 + $0x10] sm:$0xff]  }
 0x449   :  { %v1610_v31 = vmul.f32 %v2514_v17, %v1606_v24 }
 0x44a   :  { %2517 = vrcp.f32 %v1591_v58  ;;  %v1592_v60 = vadd.f32 1.0, %v1588_v48  ;;  %v1644_v39 = vmul.f32 %v1640_v36, %v1584_v23  ;;  %v1648_v20 = vmul.f32 1.442695, %v1643_v5 }
 0x44b   :  { %v1614_v61 = vadd.f32 1.4214138, %v1610_v31 }
 0x44c   :  { %2519 = vrcp.f32 %v1592_v60  ;;  %v1650_v55 = vmul.f32 1.442695, %v1644_v39 }
 0x44d   :  { %v1618_v4 = vmul.f32 %v2514_v17, %v1614_v61  ;;  %2521 = vpow2.f32 %v1648_v20  ;;  %v1576_v20 = vmul.f32 0.5, %v3349_v32  ;;  %v2431_v32 = vld [vmem:[%s3432_s3 + $0x30] sm:$0xff]  }
 0x44f   :  { %v1622_v0 = vadd.f32 -0.28449672, %v1618_v4 }
 0x451   :  { %v1626_v37 = vmul.f32 %v2514_v17, %v1622_v0 }
 0x453   :  { %v1630_v8 = vadd.f32 0.2548296, %v1626_v37 }
 0x455   :  { %v1634_v19 = vmul.f32 %v2514_v17, %v1630_v8  ;;  %v3356_v47 = vpop.f32.mrf.mxu1 }
 0x456   :  { %v3359_v42 = vmul.f32 0.70710677, %v3356_v47 }
 0x457   :  { %v2518_v29 = vpop.eup %2517  ;;  %v1654_v54 = vmul.f32 %v2516_v9, %v1634_v19  ;;  %v2374_v13 = vpop.f32.mrf.mxu1  ;;  %v1575_v9 = vmul.f32 0.5, %v3344_v57  ;;  %v2428_v57 = vld [vmem:[%s3432_s3 + $0x18] sm:$0xff]  }
 0x458   :  { %v1603_v56 = vmul.f32 1.0614054, %v2518_v29  ;;  %v1585_v44 = vand.u32 2147483647, %v3359_v42  ;;  %vm1665_vm5 = vcmp.ge.f32.partialorder %v3359_v42, 0.0 }
 0x459   :  { %v1658_v52 = vsub.f32 1.0, %v1654_v54  ;;  %v2520_v50 = vpop.eup %2519 }
 0x45a   :  { %v1607_v15 = vadd.f32 -1.4531521, %v1603_v56  ;;  %v1589_v25 = vmul.f32 0.3275911, %v1585_v44  ;;  %v1604_v59 = vmul.f32 1.0614054, %v2520_v50  ;;  %v2522_v23 = vpop.eup %2521 }
 0x45b   :  { %v1666_v26 = vsub.f32 0.0, %v1658_v52  ;;  %v1641_v14 = vsub.f32 0.0, %v1585_v44 }
 0x45c   :  { %v1611_v2 = vmul.f32 %v2518_v29, %v1607_v15  ;;  %v1593_v28 = vadd.f32 1.0, %v1589_v25  ;;  %v1608_v45 = vadd.f32 -1.4531521, %v1604_v59 }
 0x45d   :  { %v1670_v18 = vsel %vm1662_vm0, %v1658_v52, %v1666_v26  ;;  %v1645_v53 = vmul.f32 %v1641_v14, %v1585_v44 }
 0x45e   :  { %v1674_v62 = vadd.f32 1.0, %v1670_v18  ;;  %v1615_v38 = vadd.f32 1.4214138, %v1611_v2  ;;  %2523 = vrcp.f32 %v1593_v28  ;;  %v1612_v12 = vmul.f32 %v2520_v50, %v1608_v45  ;;  %v2430_v2 = vld [vmem:[%s3432_s3 + $0x28] sm:$0xff]  }
 0x45f   :  { %2525 = vpow2.f32 %v1650_v55  ;;  %v1652_v0 = vmul.f32 1.442695, %v1645_v53 }
 0x460   :  { %v1678_v43 = vmul.f32 %v1674_v62, %v1574_v7  ;;  %v1619_v30 = vmul.f32 %v2518_v29, %v1615_v38  ;;  %v1616_v40 = vadd.f32 1.4214138, %v1612_v12  ;;  %v1577_v12 = vmul.f32 0.5, %v3356_v47 }
 0x461   :  { %2527 = vpow2.f32 %v1652_v0 }
 0x462   :  { %v1682_v1 = vpack.c.bf16 %v1678_v43, %v1678_v43  ;;  %v1623_v22 = vadd.f32 -0.28449672, %v1619_v30  ;;  %v1620_v21 = vmul.f32 %v2520_v50, %v1616_v40 }
 0x464   :  { %v1627_v3 = vmul.f32 %v2518_v29, %v1623_v22  ;;  %2399 = vmatprep.subr.msk.bf16.mxu0 %vm1718_vm1, %v1682_v1  ;;  %v1720_v33 = vsel %vm1718_vm1, %v1682_v1, 0  ;;  %v1624_v17 = vadd.f32 -0.28449672, %v1620_v21  ;;  %v2432_v22 = vld [vmem:[%s3432_s3 + $0x38] sm:$0xff]   ;;  %s2561_s3 = smov [#allocation2]  }
 0x465   :  { %2376 = vmatpush3.bf16.msra.mxu0 %v1720_v33  ;;  %s2040_s23 = sshll.u32 %s2561_s3, 4  ;;  %s2041_s23 = int_to_ptr.vmem [resolvable:$true] %s2040_s23 }
 0x466   :  { %v1631_v16 = vadd.f32 0.2548296, %v1627_v3  ;;  %v1628_v51 = vmul.f32 %v2520_v50, %v1624_v17  ;;  %s2529_s24 = scalar_lea.vmem %s2041_s23, 512  ;;  %p2534_p1 = scmp.lt.s32.totalorder %s2041_s23, %s2041_s23 }
 0x467   :  { %p2530_p0 = scmp.ne.s32.totalorder %s2041_s23, %s2529_s24  ;;  %p2535_p2 = scmp.lt.s32.totalorder %s2529_s24, %s2529_s24 }
 0x468   :  { %v1635_v41 = vmul.f32 %v2518_v29, %v1631_v16  ;;  %2378 = vmatmul.mubr.msk.bf16.vlgmr.msra.gmra.mxu0 %vm240_vm4, %v2426_v34  ;;  %v1632_v24 = vadd.f32 0.2548296, %v1628_v51 }
 0x469   :  { %2383 = vmatprep.mubr.msk.bf16.mxu0 %vm240_vm4, %v2427_v35  ;;  %p2536_p3 = por %p2535_p2, %p2534_p1 }
 0x46a   :  { %v1655_v58 = vmul.f32 %v2522_v23, %v1635_v41  ;;  %v1636_v31 = vmul.f32 %v2520_v50, %v1632_v24 }
 0x46b   :  { %v2524_v48 = vpop.eup %2523  ;;  %p2537_p4 = pnand %p2536_p3, %p2530_p0 }
 0x46c   :  { %v2526_v60 = vpop.eup %2525  ;;  %v1659_v61 = vsub.f32 1.0, %v1655_v58  ;;  %v1605_v4 = vmul.f32 1.0614054, %v2524_v48 }
 0x46d   :  { %v1656_v27 = vmul.f32 %v2526_v60, %v1636_v31 }
 0x46e   :  { %v1667_v37 = vsub.f32 0.0, %v1659_v61  ;;  %v1609_v8 = vadd.f32 -1.4531521, %v1605_v4  ;;  %v2528_v18 = vpop.eup %2527 }
 0x46f   :  { %v1660_v36 = vsub.f32 1.0, %v1656_v27 }
 0x470   :  { %v1671_v5 = vsel %vm1663_vm3, %v1659_v61, %v1667_v37  ;;  %v1613_v19 = vmul.f32 %v2524_v48, %v1609_v8 }
 0x471   :  { %v1675_v29 = vadd.f32 1.0, %v1671_v5  ;;  %v1668_v54 = vsub.f32 0.0, %v1660_v36 }
 0x472   :  { %v1617_v39 = vadd.f32 1.4214138, %v1613_v19 }
 0x473   :  { %v1679_v13 = vmul.f32 %v1675_v29, %v1575_v9  ;;  %v1672_v56 = vsel %vm1664_vm2, %v1660_v36, %v1668_v54 }
 0x474   :  { %v1676_v44 = vadd.f32 1.0, %v1672_v56  ;;  %v1621_v52 = vmul.f32 %v2524_v48, %v1617_v39 }
 0x475   :  { %v1683_v50 = vpack.c.bf16 %v1679_v13, %v1679_v13 }
 0x476   :  { %v1680_v15 = vmul.f32 %v1676_v44, %v1576_v20  ;;  %v1625_v11 = vadd.f32 -0.28449672, %v1621_v52 }
 0x477   :  { %2400 = vmatprep.subr.msk.bf16.mxu0 %vm1718_vm1, %v1683_v50  ;;  %v1788_v25 = vsel %vm1718_vm1, %v1683_v50, 0 }
 0x478   :  { %v1684_v26 = vpack.c.bf16 %v1680_v15, %v1680_v15  ;;  %v1629_v49 = vmul.f32 %v2524_v48, %v1625_v11  ;;  %2382 = vmatpush3.bf16.msra.mxu0 %v1788_v25 }
 0x47a   :  { %v1633_v59 = vadd.f32 0.2548296, %v1629_v49  ;;  %2401 = vmatprep.subr.msk.bf16.mxu1 %vm1718_vm1, %v1684_v26  ;;  %v1856_v55 = vsel %vm1718_vm1, %v1684_v26, 0 }
 0x47b   :  { %2388 = vmatpush3.bf16.msra.mxu1 %v1856_v55  ;;  %2384 = vmatmul.mubr.msk.bf16.vlgmr.msra.gmra.mxu0 %vm240_vm4, %v2428_v57 }
 0x47c   :  { %v1637_v28 = vmul.f32 %v2524_v48, %v1633_v59  ;;  %2395 = vmatprep.mubr.msk.bf16.mxu0 %vm240_vm4, %v2431_v32 }
 0x47e   :  { %v1657_v45 = vmul.f32 %v2528_v18, %v1637_v28  ;;  %2390 = vmatmul.mubr.msk.bf16.vlgmr.msra.gmra.mxu1 %vm240_vm4, %v2430_v2 }
 0x480   :  { %v1661_v7 = vsub.f32 1.0, %v1657_v45 }
 0x482   :  { %v1669_v62 = vsub.f32 0.0, %v1661_v7 }
 0x484   :  { %v1673_v38 = vsel %vm1665_vm5, %v1661_v7, %v1669_v62 }
 0x485   :  { %v1677_v43 = vadd.f32 1.0, %v1673_v38 }
 0x487   :  { %v1681_v30 = vmul.f32 %v1677_v43, %v1577_v12 }
 0x489   :  { %v1685_v40 = vpack.c.bf16 %v1681_v30, %v1681_v30 }
 0x48b   :  { %2402 = vmatprep.subr.msk.bf16.mxu0 %vm1718_vm1, %v1685_v40  ;;  %v1924_v1 = vsel %vm1718_vm1, %v1685_v40, 0 }
 0x48c   :  { %2394 = vmatpush3.bf16.msra.mxu0 %v1924_v1 }
 0x48f   :  { %2396 = vmatmul.mubr.msk.bf16.vlgmr.msra.gmra.mxu0 %vm240_vm4, %v2432_v22 }
 0x528   :  { %v2379_v21 = vpop.f32.mrf.mxu0 }
 0x529   :  { %v1989_v16 = vsel %vm802_vm11, %v2379_v21, 0.0 }
 0x52a   :  { %v1756_v3 = vpop.f32.mrf.mxu0 }
 0x52b   :  { %v1975_v41 = vsel %vm802_vm11, %v1756_v3, 0.0 }
 0x52c   :  { %v2380_v42 = vpop.f32.mrf.mxu0 }
 0x52d   :  { %v1996_v48 = vsel %vm802_vm11, %v2380_v42, 0.0 }
 0x52e   :  { %v1759_v14 = vpop.f32.mrf.mxu0 }
 0x52f   :  { %v1982_v5 = vsel %vm802_vm11, %v1759_v14, 0.0 }
 0x53b   :  { %v2385_v33 = vpop.f32.mrf.mxu0 }
 0x53c   :  { %v1990_v51 = vsel %vm802_vm11, %v2385_v33, 0.0 }
 0x53d   :  { %v1824_v47 = vpop.f32.mrf.mxu0  ;;  %v1991_v23 = vadd.f32 %v1990_v51, %v1989_v16 }
 0x53e   :  { %v2391_v34 = vpop.f32.mrf.mxu1  ;;  %v1976_v53 = vsel %vm802_vm11, %v1824_v47, 0.0 }
 0x53f   :  { %v2386_v17 = vpop.f32.mrf.mxu0  ;;  %v1992_v31 = vsel %vm802_vm11, %v2391_v34, 0.0  ;;  %v1977_v61 = vadd.f32 %v1976_v53, %v1975_v41 }
 0x540   :  { %v1892_v35 = vpop.f32.mrf.mxu1  ;;  %v1997_v60 = vsel %vm802_vm11, %v2386_v17, 0.0  ;;  %v1993_v27 = vadd.f32 %v1992_v31, %v1991_v23 }
 0x541   :  { %v1827_v24 = vpop.f32.mrf.mxu0  ;;  %v1978_v4 = vsel %vm802_vm11, %v1892_v35, 0.0  ;;  %v1998_v37 = vadd.f32 %v1997_v60, %v1996_v48 }
 0x542   :  { %v2392_v58 = vpop.f32.mrf.mxu1  ;;  %v1983_v0 = vsel %vm802_vm11, %v1827_v24, 0.0  ;;  %v1979_v29 = vadd.f32 %v1978_v4, %v1977_v61 }
 0x543   :  { %v1999_v19 = vsel %vm802_vm11, %v2392_v58, 0.0  ;;  %v1984_v54 = vadd.f32 %v1983_v0, %v1982_v5 }
 0x544   :  { %v1895_v8 = vpop.f32.mrf.mxu1  ;;  %v2000_v44 = vadd.f32 %v1999_v19, %v1998_v37 }
 0x545   :  { %v1985_v56 = vsel %vm802_vm11, %v1895_v8, 0.0 }
 0x546   :  { %v1986_v25 = vadd.f32 %v1985_v56, %v1984_v54 }
 0x54f   :  { %v2397_v36 = vpop.f32.mrf.mxu0 }
 0x550   :  { %v1994_v9 = vsel %vm802_vm11, %v2397_v36, 0.0 }
 0x551   :  { %v1995_v39 = vadd.f32 %v1994_v9, %v1993_v27  ;;  %v1960_v13 = vpop.f32.mrf.mxu0 }
 0x552   :  { %v1980_v20 = vsel %vm802_vm11, %v1960_v13, 0.0 }
 0x553   :  { %v2029_v52 = vadd.f32 %v3150_v46, %v1995_v39  ;;  %v1981_v50 = vadd.f32 %v1980_v20, %v1979_v29  ;;  %v2398_v15 = vpop.f32.mrf.mxu0 }
 0x554   :  { %v2001_v11 = vsel %vm802_vm11, %v2398_v15, 0.0 }
 0x555   :  { %2033 = vst.msk [vmem:[#allocation2 + $0x10] sm:$0xff] %vm802_vm11, %v2029_v52  ;;  %v2027_v57 = vadd.f32 %v3148_v63, %v1981_v50  ;;  %v2002_v26 = vadd.f32 %v2001_v11, %v2000_v44  ;;  %v1963_v49 = vpop.f32.mrf.mxu0 }
 0x556   :  { %v1987_v32 = vsel %vm802_vm11, %v1963_v49, 0.0 }
 0x557   :  { %2031 = vst.msk [vmem:[#allocation2] sm:$0xff] %vm802_vm11, %v2027_v57  ;;  %v2030_v59 = vadd.f32 %v3152_v6, %v2002_v26  ;;  %v1988_v46 = vadd.f32 %v1987_v32, %v1986_v25 }
 0x559   :  { %2034 = vst.msk [vmem:[#allocation2 + $0x18] sm:$0xff] %vm802_vm11, %v2030_v59  ;;  %v2028_v55 = vadd.f32 %v3146_v10, %v1988_v46 }
 0x55b   :  { %2032 = vst.msk [vmem:[#allocation2 + $0x8] sm:$0xff] %vm802_vm11, %v2028_v55 }
 0x55c   :  { %2540 = shalt.err (!%p2537_p4)
}
 0x55d   :  { %s2562_s25 = smov 128   ;;  %s2563_s26 = smov 8  }
 0x55e   :  { %2046 = dma.vmem_to_hbm [thread:$0]  %s2041_s23, 512, %s3434_s5, [#allocation3], %s2562_s25, %s2562_s25, %s2563_s26  }
 0x55f   :  { %2549 = dma.done.wait [#allocation3], 512  }
 0x560   :  { %2550 = vsyncadd [#allocation3], 4294966784 }
 0x561   :  { %2054 = vsyncpa [#allocation3], 1 }

</bundles_post_ra>
